<compile_context>
chip_gen: v7x
topology: tpu7x:2x2x1
jax: 0.10.0
libtpu: 0.0.40
codegen_flags: <defaults>
</compile_context>

<pallas_src>
import functools

import jax
import jax.numpy as jnp
from jax.experimental import pallas as pl
from jax.experimental.pallas import tpu as pltpu

# ----------------------------- model config ---------------------------------
BATCH = 2
SEQ = 8
HIDDEN = 32
NUM_HEADS = 4
HEAD_DIM = HIDDEN // NUM_HEADS
INTERMEDIATE = 64
NUM_LAYERS = 2
VOCAB = 64
LN_EPS = 1e-5
# Large-but-finite additive mask (finfo.min can NaN through the s - max path).
NEG_INF = -1e9

# ------------------------ packed-constant slab layout ------------------------
CONST_W = 128                                   # lane width of the slab
PER_LAYER_ROWS = 8                              # 6 vectors + qkv bias + fc1 bias
FLN_ROW = NUM_LAYERS * PER_LAYER_ROWS           # final-LN gamma/beta rows
CONST_PARAM_ROWS = ((FLN_ROW + 2 + 7) // 8) * 8 # pad to sublane-tile boundary
MASK_ROW = CONST_PARAM_ROWS                     # mask rows start tile-aligned


# ----------------------------- Pallas kernel ---------------------------------
def _layer_norm(x, gamma, beta):
    mu = jnp.mean(x, axis=-1, keepdims=True)
    var = jnp.mean(jnp.square(x - mu), axis=-1, keepdims=True)
    return (x - mu) * jax.lax.rsqrt(var + LN_EPS) * gamma + beta


def clip_text_kernel(h_ref, const_ref, wqkv_ref, wo_ref, w1_ref, w2_ref, out_ref):
    """Entire CLIP text encoder (all layers + final LN) in one kernel.

    h_ref    : (B*S, D)        flattened hidden states
    const_ref: (MASK_ROW+B*S, 128) packed slab:
               per layer l (rows l*8 .. l*8+7):
                 [ln1_g, ln1_b, ln2_g, ln2_b, b_out, b_fc2, bqkv(3D), b_fc1(I)]
               rows FLN_ROW / FLN_ROW+1: final-LN gamma / beta
               rows MASK_ROW.. : additive attention mask, flattened (B*S, S)
    wqkv_ref : (L, D, 3D)      fused q/k/v projection (Q scale pre-folded)
    wo_ref   : (L, D, D)       output projection
    w1_ref   : (L, D, I) / w2_ref: (L, I, D)  MLP weights
    out_ref  : (2, B*S, D)     [0] = final_ln(h), [1] = h before final LN
    """
    x = h_ref[...]                                              # (B*S, D) f32
    mask3 = const_ref[MASK_ROW:MASK_ROW + BATCH * SEQ, 0:SEQ]   # (B*S, S)
    mask3 = mask3.reshape(BATCH, SEQ, SEQ)                      # (B, S, S)

    # NOTE: static unroll is fine at L=2; for larger L switch to lax.fori_loop
    # (dynamic wqkv_ref[l] views) or a grid=(L,) BlockSpec pipeline so weights
    # stream through VMEM instead of all being resident (v7x: 64 MiB VMEM).
    for l in range(NUM_LAYERS):
        base = l * PER_LAYER_ROWS
        ln1_g = const_ref[base + 0:base + 1, 0:HIDDEN]
        ln1_b = const_ref[base + 1:base + 2, 0:HIDDEN]
        ln2_g = const_ref[base + 2:base + 3, 0:HIDDEN]
        ln2_b = const_ref[base + 3:base + 4, 0:HIDDEN]
        b_out = const_ref[base + 4:base + 5, 0:HIDDEN]
        b_fc2 = const_ref[base + 5:base + 6, 0:HIDDEN]
        bqkv = const_ref[base + 6:base + 7, 0:3 * HIDDEN]
        b_fc1 = const_ref[base + 7:base + 8, 0:INTERMEDIATE]

        # ---- self-attention block (pre-LN); Q scale folded into wqkv/bqkv ----
        xn = _layer_norm(x, ln1_g, ln1_b)
        qkv = jnp.dot(xn, wqkv_ref[l],
                      preferred_element_type=jnp.float32) + bqkv    # (B*S, 3D)
        qkv3 = qkv.reshape(BATCH, SEQ, 3 * HIDDEN)                  # (B, S, 3D)

        head_ctx = []
        for hd in range(NUM_HEADS):                 # static loop of 4, batched over B
            off = hd * HEAD_DIM
            q_h = qkv3[:, :, off:off + HEAD_DIM]                    # (B, S, Dh)
            k_h = qkv3[:, :, HIDDEN + off:HIDDEN + off + HEAD_DIM]
            v_h = qkv3[:, :, 2 * HIDDEN + off:2 * HIDDEN + off + HEAD_DIM]
            # contraction on last dims of both operands -> no explicit k.T
            s = jnp.einsum("bqd,bkd->bqk", q_h, k_h,
                           preferred_element_type=jnp.float32) + mask3
            s = s - jnp.max(s, axis=-1, keepdims=True)
            p = jnp.exp(s)
            p = p * pl.reciprocal(jnp.sum(p, axis=-1, keepdims=True), approx=False)
            head_ctx.append(jnp.einsum("bqk,bkd->bqd", p, v_h,
                                       preferred_element_type=jnp.float32))
        ctx = jnp.concatenate(head_ctx, axis=-1).reshape(BATCH * SEQ, HIDDEN)

        # single concatenated-ctx @ Wo; output-proj bias added exactly once
        x = x + jnp.dot(ctx, wo_ref[l],
                        preferred_element_type=jnp.float32) + b_out

        # ---- MLP block (pre-LN, quick_gelu) ----
        xn2 = _layer_norm(x, ln2_g, ln2_b)
        a = jnp.dot(xn2, w1_ref[l], preferred_element_type=jnp.float32) + b_fc1
        a = a * jax.nn.sigmoid(1.702 * a)                           # quick_gelu
        x = x + jnp.dot(a, w2_ref[l], preferred_element_type=jnp.float32) + b_fc2

    out_ref[1, :, :] = x                                            # pre-final-LN
    out_ref[0, :, :] = _layer_norm(
        x,
        const_ref[FLN_ROW:FLN_ROW + 1, 0:HIDDEN],
        const_ref[FLN_ROW + 1:FLN_ROW + 2, 0:HIDDEN])


# ----------------------------- wrapper ---------------------------------------
def clip_text_forward(params, input_ids, attention_mask):
    """Mirrors CLIPTextWrapper.forward -> (final_ln(h), h)."""
    bsz, seq_len = input_ids.shape
    assert (bsz, seq_len) == (BATCH, SEQ), "kernel compiled for (BATCH, SEQ)"
    input_ids = input_ids.reshape(-1, seq_len)

    # Embeddings (gather glue stays in plain JAX; fuses into the jit).
    tok = jnp.take(params["token_emb"], input_ids, axis=0)          # (B, S, D)
    pos = params["pos_emb"][:seq_len]                               # (S, D)
    hidden = (tok + pos[None, :, :]).astype(jnp.float32)
    h_flat = hidden.reshape(bsz * seq_len, HIDDEN)

    # Combined causal + padding additive mask, flattened to (B*S, S) rows and
    # appended to the packed-constant slab (one operand, one VMEM tile group).
    q_idx = jnp.arange(seq_len)[:, None]
    k_idx = jnp.arange(seq_len)[None, :]
    causal_ok = k_idx <= q_idx                                      # (S, S)
    key_ok = attention_mask.astype(bool)[:, None, :]                # (B, 1, S)
    allowed = jnp.logical_and(causal_ok[None, :, :], key_ok)        # (B, S, S)
    mask = jnp.where(allowed, 0.0, NEG_INF).astype(jnp.float32)
    mask_rows = jnp.pad(mask.reshape(bsz * seq_len, seq_len),
                        ((0, 0), (0, CONST_W - seq_len)))           # (B*S, 128)
    const = jnp.concatenate([params["const"], mask_rows], axis=0)   # (40, 128)

    vmem = pl.BlockSpec(memory_space=pltpu.MemorySpace.VMEM)
    out = pl.pallas_call(
        clip_text_kernel,
        out_shape=jax.ShapeDtypeStruct((2, bsz * seq_len, HIDDEN), jnp.float32),
        in_specs=[vmem] * 6,
        out_specs=vmem,
    )(h_flat, const,
      params["wqkv"], params["wo"], params["w1"], params["w2"])

    last_hidden_state = out[0].reshape(bsz, seq_len, HIDDEN)
    encoder_hidden = out[1].reshape(bsz, seq_len, HIDDEN)
    # encoder_outputs (return_dict=False) == (hidden-before-final-LN,)
    return last_hidden_state, encoder_hidden


# ----------------------------- parameter init --------------------------------
def init_params(key):
    def nrm(k, shape, std=0.02):
        return (std * jax.random.normal(k, shape)).astype(jnp.float32)

    def row(v):
        v = v.astype(jnp.float32)
        return jnp.pad(v, (0, CONST_W - v.shape[0]))

    keys = iter(jax.random.split(key, 4 + 16 * NUM_LAYERS))
    nk = lambda: next(keys)

    token_emb = nrm(nk(), (VOCAB, HIDDEN))
    pos_emb = nrm(nk(), (SEQ, HIDDEN))
    fln_g = 1.0 + 0.02 * jax.random.normal(nk(), (HIDDEN,))
    fln_b = 0.02 * jax.random.normal(nk(), (HIDDEN,))

    scale = jnp.float32(HEAD_DIM) ** -0.5
    wqkv, wo, w1, w2, rows = [], [], [], [], []
    for _ in range(NUM_LAYERS):
        wq = nrm(nk(), (HIDDEN, HIDDEN))
        wk = nrm(nk(), (HIDDEN, HIDDEN))
        wv = nrm(nk(), (HIDDEN, HIDDEN))
        bq = 0.02 * jax.random.normal(nk(), (HIDDEN,))
        bk = 0.02 * jax.random.normal(nk(), (HIDDEN,))
        bv = 0.02 * jax.random.normal(nk(), (HIDDEN,))
        # fold the 1/sqrt(HEAD_DIM) attention scale into the Q projection
        wqkv.append(jnp.concatenate([wq * scale, wk, wv], axis=1))  # (D, 3D)
        bqkv = jnp.concatenate([bq * scale, bk, bv])                # (3D,)
        wo.append(nrm(nk(), (HIDDEN, HIDDEN)))
        w1.append(nrm(nk(), (HIDDEN, INTERMEDIATE)))
        w2.append(nrm(nk(), (INTERMEDIATE, HIDDEN)))
        ln1_g = 1.0 + 0.02 * jax.random.normal(nk(), (HIDDEN,))
        ln1_b = 0.02 * jax.random.normal(nk(), (HIDDEN,))
        ln2_g = 1.0 + 0.02 * jax.random.normal(nk(), (HIDDEN,))
        ln2_b = 0.02 * jax.random.normal(nk(), (HIDDEN,))
        b_out = 0.02 * jax.random.normal(nk(), (HIDDEN,))
        b_fc2 = 0.02 * jax.random.normal(nk(), (HIDDEN,))
        b_fc1 = 0.02 * jax.random.normal(nk(), (INTERMEDIATE,))
        rows += [row(ln1_g), row(ln1_b), row(ln2_g), row(ln2_b),
                 row(b_out), row(b_fc2), row(bqkv), row(b_fc1)]
    rows += [row(fln_g), row(fln_b)]
    while len(rows) < CONST_PARAM_ROWS:                             # tile-align
        rows.append(jnp.zeros((CONST_W,), jnp.float32))

    return dict(
        token_emb=token_emb, pos_emb=pos_emb,
        const=jnp.stack(rows).astype(jnp.float32),                  # (24, 128)
        wqkv=jnp.stack(wqkv), wo=jnp.stack(wo),
        w1=jnp.stack(w1), w2=jnp.stack(w2))


# ----------------------------- pure-JAX reference ----------------------------
def _ref_forward(params, input_ids, attention_mask):
    def ln(x, g, b):
        mu = x.mean(-1, keepdims=True)
        var = ((x - mu) ** 2).mean(-1, keepdims=True)
        return (x - mu) / jnp.sqrt(var + LN_EPS) * g + b

    B, S = input_ids.shape
    const = params["const"]
    h = jnp.take(params["token_emb"], input_ids, axis=0) + params["pos_emb"][None, :S]
    q_idx, k_idx = jnp.arange(S)[:, None], jnp.arange(S)[None, :]
    allowed = (k_idx <= q_idx)[None] & attention_mask.astype(bool)[:, None, :]
    mask = jnp.where(allowed, 0.0, NEG_INF)[:, None, :, :]          # (B,1,S,S)

    for l in range(NUM_LAYERS):
        base = l * PER_LAYER_ROWS
        ln1_g, ln1_b = const[base + 0, :HIDDEN], const[base + 1, :HIDDEN]
        ln2_g, ln2_b = const[base + 2, :HIDDEN], const[base + 3, :HIDDEN]
        b_out, b_fc2 = const[base + 4, :HIDDEN], const[base + 5, :HIDDEN]
        bqkv = const[base + 6, :3 * HIDDEN]
        b_fc1 = const[base + 7, :INTERMEDIATE]

        xn = ln(h, ln1_g, ln1_b)
        qkv = xn @ params["wqkv"][l] + bqkv          # Q scale already folded in
        q = qkv[..., 0:HIDDEN].reshape(B, S, NUM_HEADS, HEAD_DIM).transpose(0, 2, 1, 3)
        k = qkv[..., HIDDEN:2 * HIDDEN].reshape(B, S, NUM_HEADS, HEAD_DIM).transpose(0, 2, 1, 3)
        v = qkv[..., 2 * HIDDEN:].reshape(B, S, NUM_HEADS, HEAD_DIM).transpose(0, 2, 1, 3)
        s = jnp.einsum("bhqd,bhkd->bhqk", q, k) + mask
        p_attn = jax.nn.softmax(s, axis=-1)
        ctx = jnp.einsum("bhqk,bhkd->bhqd", p_attn, v)
        ctx = ctx.transpose(0, 2, 1, 3).reshape(B, S, HIDDEN)
        h = h + ctx @ params["wo"][l] + b_out
        xn2 = ln(h, ln2_g, ln2_b)
        a = xn2 @ params["w1"][l] + b_fc1
        a = a * jax.nn.sigmoid(1.702 * a)
        h = h + a @ params["w2"][l] + b_fc2

    fln_g, fln_b = const[FLN_ROW, :HIDDEN], const[FLN_ROW + 1, :HIDDEN]
    return ln(h, fln_g, fln_b), h


# ----------------------------- main ------------------------------------------
if __name__ == "__main__":
    key = jax.random.PRNGKey(0)
    k_param, k_ids = jax.random.split(key)
    params = init_params(k_param)

    input_ids = jax.random.randint(k_ids, (BATCH, SEQ), 0, VOCAB, dtype=jnp.int32)
    # second sequence has 2 padding positions at the end
    attention_mask = jnp.array(
        [[1] * SEQ, [1] * (SEQ - 2) + [0, 0]], dtype=jnp.int32)

    fwd = jax.jit(functools.partial(clip_text_forward, params))
    last_hidden_state, encoder_hidden = fwd(input_ids, attention_mask)
    jax.block_until_ready((last_hidden_state, encoder_hidden))

    ref_last, ref_hidden = _ref_forward(params, input_ids, attention_mask)
    assert jnp.allclose(last_hidden_state, ref_last, atol=1e-4, rtol=1e-4)
    assert jnp.allclose(encoder_hidden, ref_hidden, atol=1e-4, rtol=1e-4)

    print("KERNEL_OK")
</pallas_src>

<mosaic_0001>
module attributes {stable_mosaic.version = 11 : i64} {
  func.func @clip_text_kernel(%arg0: memref<16x32xf32, #tpu.memory_space<vmem>>, %arg1: memref<40x128xf32, #tpu.memory_space<vmem>>, %arg2: memref<2x32x96xf32, #tpu.memory_space<vmem>>, %arg3: memref<2x32x32xf32, #tpu.memory_space<vmem>>, %arg4: memref<2x32x64xf32, #tpu.memory_space<vmem>>, %arg5: memref<2x64x32xf32, #tpu.memory_space<vmem>>, %arg6: memref<2x16x32xf32, #tpu.memory_space<vmem>>) attributes {dimension_semantics = [], scalar_prefetch = 0 : i64, scratch_operands = 0 : i64, tpu.core_type = #tpu.core_type<tc>} {
    %c0 = arith.constant 0 : index
    %c0_0 = arith.constant 0 : index
    %0 = vector.load %arg0[%c0, %c0_0] : memref<16x32xf32, #tpu.memory_space<vmem>>, vector<16x32xf32>
    %c24 = arith.constant 24 : index
    %c0_1 = arith.constant 0 : index
    %1 = vector.load %arg1[%c24, %c0_1] : memref<40x128xf32, #tpu.memory_space<vmem>>, vector<16x8xf32>
    %2 = vector.shape_cast %1 : vector<16x8xf32> to vector<2x8x8xf32>
    %c0_2 = arith.constant 0 : index
    %c0_3 = arith.constant 0 : index
    %3 = vector.load %arg1[%c0_2, %c0_3] : memref<40x128xf32, #tpu.memory_space<vmem>>, vector<1x32xf32>
    %c1 = arith.constant 1 : index
    %c0_4 = arith.constant 0 : index
    %4 = vector.load %arg1[%c1, %c0_4] : memref<40x128xf32, #tpu.memory_space<vmem>>, vector<1x32xf32>
    %c2 = arith.constant 2 : index
    %c0_5 = arith.constant 0 : index
    %5 = vector.load %arg1[%c2, %c0_5] : memref<40x128xf32, #tpu.memory_space<vmem>>, vector<1x32xf32>
    %c3 = arith.constant 3 : index
    %c0_6 = arith.constant 0 : index
    %6 = vector.load %arg1[%c3, %c0_6] : memref<40x128xf32, #tpu.memory_space<vmem>>, vector<1x32xf32>
    %c4 = arith.constant 4 : index
    %c0_7 = arith.constant 0 : index
    %7 = vector.load %arg1[%c4, %c0_7] : memref<40x128xf32, #tpu.memory_space<vmem>>, vector<1x32xf32>
    %c5 = arith.constant 5 : index
    %c0_8 = arith.constant 0 : index
    %8 = vector.load %arg1[%c5, %c0_8] : memref<40x128xf32, #tpu.memory_space<vmem>>, vector<1x32xf32>
    %c6 = arith.constant 6 : index
    %c0_9 = arith.constant 0 : index
    %9 = vector.load %arg1[%c6, %c0_9] : memref<40x128xf32, #tpu.memory_space<vmem>>, vector<1x96xf32>
    %c7 = arith.constant 7 : index
    %c0_10 = arith.constant 0 : index
    %10 = vector.load %arg1[%c7, %c0_10] : memref<40x128xf32, #tpu.memory_space<vmem>>, vector<1x64xf32>
    %cst = arith.constant dense<0.000000e+00> : vector<16xf32>
    %11 = vector.multi_reduction <add>, %0, %cst [1] : vector<16x32xf32> to vector<16xf32>
    %12 = vector.shape_cast %11 : vector<16xf32> to vector<16x1xf32>
    %cst_11 = arith.constant 3.200000e+01 : f32
    %13 = vector.broadcast %cst_11 : f32 to vector<16x1xf32>
    %14 = arith.divf %12, %13 : vector<16x1xf32>
    %15 = vector.broadcast %14 : vector<16x1xf32> to vector<16x32xf32>
    %16 = arith.subf %0, %15 : vector<16x32xf32>
    %17 = arith.mulf %16, %16 : vector<16x32xf32>
    %cst_12 = arith.constant dense<0.000000e+00> : vector<16xf32>
    %18 = vector.multi_reduction <add>, %17, %cst_12 [1] : vector<16x32xf32> to vector<16xf32>
    %19 = vector.shape_cast %18 : vector<16xf32> to vector<16x1xf32>
    %cst_13 = arith.constant 3.200000e+01 : f32
    %20 = vector.broadcast %cst_13 : f32 to vector<16x1xf32>
    %21 = arith.divf %19, %20 : vector<16x1xf32>
    %22 = vector.broadcast %14 : vector<16x1xf32> to vector<16x32xf32>
    %23 = arith.subf %0, %22 : vector<16x32xf32>
    %cst_14 = arith.constant 9.99999974E-6 : f32
    %24 = vector.broadcast %cst_14 : f32 to vector<16x1xf32>
    %25 = arith.addf %21, %24 : vector<16x1xf32>
    %26 = math.rsqrt %25 : vector<16x1xf32>
    %27 = vector.broadcast %26 : vector<16x1xf32> to vector<16x32xf32>
    %28 = arith.mulf %23, %27 : vector<16x32xf32>
    %29 = vector.broadcast %3 : vector<1x32xf32> to vector<16x32xf32>
    %30 = arith.mulf %28, %29 : vector<16x32xf32>
    %31 = vector.broadcast %4 : vector<1x32xf32> to vector<16x32xf32>
    %32 = arith.addf %30, %31 : vector<16x32xf32>
    %c0_15 = arith.constant 0 : index
    %c0_16 = arith.constant 0 : index
    %c0_17 = arith.constant 0 : index
    %33 = vector.load %arg2[%c0_15, %c0_16, %c0_17] : memref<2x32x96xf32, #tpu.memory_space<vmem>>, vector<1x32x96xf32>
    %34 = vector.shape_cast %33 : vector<1x32x96xf32> to vector<32x96xf32>
    %cst_18 = arith.constant dense<0.000000e+00> : vector<16x96xf32>
    %35 = tpu.matmul %32, %34, %cst_18 {dimension_numbers = #tpu.dot_dimension_numbers<[1], [0], [0], [1], [0, 0, 1, 1], [], []>} : vector<16x32xf32>, vector<32x96xf32>, vector<16x96xf32> -> vector<16x96xf32>
    %36 = vector.broadcast %9 : vector<1x96xf32> to vector<16x96xf32>
    %37 = arith.addf %35, %36 : vector<16x96xf32>
    %38 = vector.shape_cast %37 : vector<16x96xf32> to vector<2x8x96xf32>
    %39 = vector.extract_strided_slice %38 {offsets = [0, 0, 0], sizes = [2, 8, 8], strides = [1, 1, 1]} : vector<2x8x96xf32> to vector<2x8x8xf32>
    %40 = vector.extract_strided_slice %38 {offsets = [0, 0, 32], sizes = [2, 8, 8], strides = [1, 1, 1]} : vector<2x8x96xf32> to vector<2x8x8xf32>
    %41 = vector.extract_strided_slice %38 {offsets = [0, 0, 64], sizes = [2, 8, 8], strides = [1, 1, 1]} : vector<2x8x96xf32> to vector<2x8x8xf32>
    "tpu.trace_start"() <{level = 10 : i32, message = "bqd,bkd->bqk"}> : () -> ()
    %cst_19 = arith.constant dense<0.000000e+00> : vector<2x8x8xf32>
    %42 = tpu.matmul %39, %40, %cst_19 {dimension_numbers = #tpu.dot_dimension_numbers<[2], [2], [1], [1], [0, 0, 0, 1, 1, 1], [0], [0]>} : vector<2x8x8xf32>, vector<2x8x8xf32>, vector<2x8x8xf32> -> vector<2x8x8xf32>
    "tpu.trace_stop"() : () -> ()
    %43 = arith.addf %42, %2 : vector<2x8x8xf32>
    %cst_20 = arith.constant dense<0xFF800000> : vector<2x8xf32>
    %44 = vector.multi_reduction <maximumf>, %43, %cst_20 [2] : vector<2x8x8xf32> to vector<2x8xf32>
    %45 = vector.shape_cast %44 : vector<2x8xf32> to vector<2x8x1xf32>
    %46 = vector.broadcast %45 : vector<2x8x1xf32> to vector<2x8x8xf32>
    %47 = arith.subf %43, %46 : vector<2x8x8xf32>
    %48 = math.exp %47 : vector<2x8x8xf32>
    %cst_21 = arith.constant dense<0.000000e+00> : vector<2x8xf32>
    %49 = vector.multi_reduction <add>, %48, %cst_21 [2] : vector<2x8x8xf32> to vector<2x8xf32>
    %50 = vector.shape_cast %49 : vector<2x8xf32> to vector<2x8x1xf32>
    %51 = tpu.reciprocal %50 : vector<2x8x1xf32> -> vector<2x8x1xf32>
    %52 = vector.broadcast %51 : vector<2x8x1xf32> to vector<2x8x8xf32>
    %53 = arith.mulf %48, %52 : vector<2x8x8xf32>
    "tpu.trace_start"() <{level = 10 : i32, message = "bqk,bkd->bqd"}> : () -> ()
    %cst_22 = arith.constant dense<0.000000e+00> : vector<2x8x8xf32>
    %54 = tpu.matmul %53, %41, %cst_22 {dimension_numbers = #tpu.dot_dimension_numbers<[2], [1], [1], [2], [0, 0, 0, 1, 1, 2], [0], [0]>} : vector<2x8x8xf32>, vector<2x8x8xf32>, vector<2x8x8xf32> -> vector<2x8x8xf32>
    "tpu.trace_stop"() : () -> ()
    %55 = vector.extract_strided_slice %38 {offsets = [0, 0, 8], sizes = [2, 8, 8], strides = [1, 1, 1]} : vector<2x8x96xf32> to vector<2x8x8xf32>
    %56 = vector.extract_strided_slice %38 {offsets = [0, 0, 40], sizes = [2, 8, 8], strides = [1, 1, 1]} : vector<2x8x96xf32> to vector<2x8x8xf32>
    %57 = vector.extract_strided_slice %38 {offsets = [0, 0, 72], sizes = [2, 8, 8], strides = [1, 1, 1]} : vector<2x8x96xf32> to vector<2x8x8xf32>
    "tpu.trace_start"() <{level = 10 : i32, message = "bqd,bkd->bqk"}> : () -> ()
    %cst_23 = arith.constant dense<0.000000e+00> : vector<2x8x8xf32>
    %58 = tpu.matmul %55, %56, %cst_23 {dimension_numbers = #tpu.dot_dimension_numbers<[2], [2], [1], [1], [0, 0, 0, 1, 1, 1], [0], [0]>} : vector<2x8x8xf32>, vector<2x8x8xf32>, vector<2x8x8xf32> -> vector<2x8x8xf32>
    "tpu.trace_stop"() : () -> ()
    %59 = arith.addf %58, %2 : vector<2x8x8xf32>
    %cst_24 = arith.constant dense<0xFF800000> : vector<2x8xf32>
    %60 = vector.multi_reduction <maximumf>, %59, %cst_24 [2] : vector<2x8x8xf32> to vector<2x8xf32>
    %61 = vector.shape_cast %60 : vector<2x8xf32> to vector<2x8x1xf32>
    %62 = vector.broadcast %61 : vector<2x8x1xf32> to vector<2x8x8xf32>
    %63 = arith.subf %59, %62 : vector<2x8x8xf32>
    %64 = math.exp %63 : vector<2x8x8xf32>
    %cst_25 = arith.constant dense<0.000000e+00> : vector<2x8xf32>
    %65 = vector.multi_reduction <add>, %64, %cst_25 [2] : vector<2x8x8xf32> to vector<2x8xf32>
    %66 = vector.shape_cast %65 : vector<2x8xf32> to vector<2x8x1xf32>
    %67 = tpu.reciprocal %66 : vector<2x8x1xf32> -> vector<2x8x1xf32>
    %68 = vector.broadcast %67 : vector<2x8x1xf32> to vector<2x8x8xf32>
    %69 = arith.mulf %64, %68 : vector<2x8x8xf32>
    "tpu.trace_start"() <{level = 10 : i32, message = "bqk,bkd->bqd"}> : () -> ()
    %cst_26 = arith.constant dense<0.000000e+00> : vector<2x8x8xf32>
    %70 = tpu.matmul %69, %57, %cst_26 {dimension_numbers = #tpu.dot_dimension_numbers<[2], [1], [1], [2], [0, 0, 0, 1, 1, 2], [0], [0]>} : vector<2x8x8xf32>, vector<2x8x8xf32>, vector<2x8x8xf32> -> vector<2x8x8xf32>
    "tpu.trace_stop"() : () -> ()
    %71 = vector.extract_strided_slice %38 {offsets = [0, 0, 16], sizes = [2, 8, 8], strides = [1, 1, 1]} : vector<2x8x96xf32> to vector<2x8x8xf32>
    %72 = vector.extract_strided_slice %38 {offsets = [0, 0, 48], sizes = [2, 8, 8], strides = [1, 1, 1]} : vector<2x8x96xf32> to vector<2x8x8xf32>
    %73 = vector.extract_strided_slice %38 {offsets = [0, 0, 80], sizes = [2, 8, 8], strides = [1, 1, 1]} : vector<2x8x96xf32> to vector<2x8x8xf32>
    "tpu.trace_start"() <{level = 10 : i32, message = "bqd,bkd->bqk"}> : () -> ()
    %cst_27 = arith.constant dense<0.000000e+00> : vector<2x8x8xf32>
    %74 = tpu.matmul %71, %72, %cst_27 {dimension_numbers = #tpu.dot_dimension_numbers<[2], [2], [1], [1], [0, 0, 0, 1, 1, 1], [0], [0]>} : vector<2x8x8xf32>, vector<2x8x8xf32>, vector<2x8x8xf32> -> vector<2x8x8xf32>
    "tpu.trace_stop"() : () -> ()
    %75 = arith.addf %74, %2 : vector<2x8x8xf32>
    %cst_28 = arith.constant dense<0xFF800000> : vector<2x8xf32>
    %76 = vector.multi_reduction <maximumf>, %75, %cst_28 [2] : vector<2x8x8xf32> to vector<2x8xf32>
    %77 = vector.shape_cast %76 : vector<2x8xf32> to vector<2x8x1xf32>
    %78 = vector.broadcast %77 : vector<2x8x1xf32> to vector<2x8x8xf32>
    %79 = arith.subf %75, %78 : vector<2x8x8xf32>
    %80 = math.exp %79 : vector<2x8x8xf32>
    %cst_29 = arith.constant dense<0.000000e+00> : vector<2x8xf32>
    %81 = vector.multi_reduction <add>, %80, %cst_29 [2] : vector<2x8x8xf32> to vector<2x8xf32>
    %82 = vector.shape_cast %81 : vector<2x8xf32> to vector<2x8x1xf32>
    %83 = tpu.reciprocal %82 : vector<2x8x1xf32> -> vector<2x8x1xf32>
    %84 = vector.broadcast %83 : vector<2x8x1xf32> to vector<2x8x8xf32>
    %85 = arith.mulf %80, %84 : vector<2x8x8xf32>
    "tpu.trace_start"() <{level = 10 : i32, message = "bqk,bkd->bqd"}> : () -> ()
    %cst_30 = arith.constant dense<0.000000e+00> : vector<2x8x8xf32>
    %86 = tpu.matmul %85, %73, %cst_30 {dimension_numbers = #tpu.dot_dimension_numbers<[2], [1], [1], [2], [0, 0, 0, 1, 1, 2], [0], [0]>} : vector<2x8x8xf32>, vector<2x8x8xf32>, vector<2x8x8xf32> -> vector<2x8x8xf32>
    "tpu.trace_stop"() : () -> ()
    %87 = vector.extract_strided_slice %38 {offsets = [0, 0, 24], sizes = [2, 8, 8], strides = [1, 1, 1]} : vector<2x8x96xf32> to vector<2x8x8xf32>
    %88 = vector.extract_strided_slice %38 {offsets = [0, 0, 56], sizes = [2, 8, 8], strides = [1, 1, 1]} : vector<2x8x96xf32> to vector<2x8x8xf32>
    %89 = vector.extract_strided_slice %38 {offsets = [0, 0, 88], sizes = [2, 8, 8], strides = [1, 1, 1]} : vector<2x8x96xf32> to vector<2x8x8xf32>
    "tpu.trace_start"() <{level = 10 : i32, message = "bqd,bkd->bqk"}> : () -> ()
    %cst_31 = arith.constant dense<0.000000e+00> : vector<2x8x8xf32>
    %90 = tpu.matmul %87, %88, %cst_31 {dimension_numbers = #tpu.dot_dimension_numbers<[2], [2], [1], [1], [0, 0, 0, 1, 1, 1], [0], [0]>} : vector<2x8x8xf32>, vector<2x8x8xf32>, vector<2x8x8xf32> -> vector<2x8x8xf32>
    "tpu.trace_stop"() : () -> ()
    %91 = arith.addf %90, %2 : vector<2x8x8xf32>
    %cst_32 = arith.constant dense<0xFF800000> : vector<2x8xf32>
    %92 = vector.multi_reduction <maximumf>, %91, %cst_32 [2] : vector<2x8x8xf32> to vector<2x8xf32>
    %93 = vector.shape_cast %92 : vector<2x8xf32> to vector<2x8x1xf32>
    %94 = vector.broadcast %93 : vector<2x8x1xf32> to vector<2x8x8xf32>
    %95 = arith.subf %91, %94 : vector<2x8x8xf32>
    %96 = math.exp %95 : vector<2x8x8xf32>
    %cst_33 = arith.constant dense<0.000000e+00> : vector<2x8xf32>
    %97 = vector.multi_reduction <add>, %96, %cst_33 [2] : vector<2x8x8xf32> to vector<2x8xf32>
    %98 = vector.shape_cast %97 : vector<2x8xf32> to vector<2x8x1xf32>
    %99 = tpu.reciprocal %98 : vector<2x8x1xf32> -> vector<2x8x1xf32>
    %100 = vector.broadcast %99 : vector<2x8x1xf32> to vector<2x8x8xf32>
    %101 = arith.mulf %96, %100 : vector<2x8x8xf32>
    "tpu.trace_start"() <{level = 10 : i32, message = "bqk,bkd->bqd"}> : () -> ()
    %cst_34 = arith.constant dense<0.000000e+00> : vector<2x8x8xf32>
    %102 = tpu.matmul %101, %89, %cst_34 {dimension_numbers = #tpu.dot_dimension_numbers<[2], [1], [1], [2], [0, 0, 0, 1, 1, 2], [0], [0]>} : vector<2x8x8xf32>, vector<2x8x8xf32>, vector<2x8x8xf32> -> vector<2x8x8xf32>
    "tpu.trace_stop"() : () -> ()
    %103 = tpu.concatenate %54, %70, %86, %102 in 2 : vector<2x8x8xf32>, vector<2x8x8xf32>, vector<2x8x8xf32>, vector<2x8x8xf32> -> vector<2x8x32xf32>
    %104 = vector.shape_cast %103 : vector<2x8x32xf32> to vector<16x32xf32>
    %c0_35 = arith.constant 0 : index
    %c0_36 = arith.constant 0 : index
    %c0_37 = arith.constant 0 : index
    %105 = vector.load %arg3[%c0_35, %c0_36, %c0_37] : memref<2x32x32xf32, #tpu.memory_space<vmem>>, vector<1x32x32xf32>
    %106 = vector.shape_cast %105 : vector<1x32x32xf32> to vector<32x32xf32>
    %cst_38 = arith.constant dense<0.000000e+00> : vector<16x32xf32>
    %107 = tpu.matmul %104, %106, %cst_38 {dimension_numbers = #tpu.dot_dimension_numbers<[1], [0], [0], [1], [0, 0, 1, 1], [], []>} : vector<16x32xf32>, vector<32x32xf32>, vector<16x32xf32> -> vector<16x32xf32>
    %108 = arith.addf %0, %107 : vector<16x32xf32>
    %109 = vector.broadcast %7 : vector<1x32xf32> to vector<16x32xf32>
    %110 = arith.addf %108, %109 : vector<16x32xf32>
    %cst_39 = arith.constant dense<0.000000e+00> : vector<16xf32>
    %111 = vector.multi_reduction <add>, %110, %cst_39 [1] : vector<16x32xf32> to vector<16xf32>
    %112 = vector.shape_cast %111 : vector<16xf32> to vector<16x1xf32>
    %cst_40 = arith.constant 3.200000e+01 : f32
    %113 = vector.broadcast %cst_40 : f32 to vector<16x1xf32>
    %114 = arith.divf %112, %113 : vector<16x1xf32>
    %115 = vector.broadcast %114 : vector<16x1xf32> to vector<16x32xf32>
    %116 = arith.subf %110, %115 : vector<16x32xf32>
    %117 = arith.mulf %116, %116 : vector<16x32xf32>
    %cst_41 = arith.constant dense<0.000000e+00> : vector<16xf32>
    %118 = vector.multi_reduction <add>, %117, %cst_41 [1] : vector<16x32xf32> to vector<16xf32>
    %119 = vector.shape_cast %118 : vector<16xf32> to vector<16x1xf32>
    %cst_42 = arith.constant 3.200000e+01 : f32
    %120 = vector.broadcast %cst_42 : f32 to vector<16x1xf32>
    %121 = arith.divf %119, %120 : vector<16x1xf32>
    %122 = vector.broadcast %114 : vector<16x1xf32> to vector<16x32xf32>
    %123 = arith.subf %110, %122 : vector<16x32xf32>
    %cst_43 = arith.constant 9.99999974E-6 : f32
    %124 = vector.broadcast %cst_43 : f32 to vector<16x1xf32>
    %125 = arith.addf %121, %124 : vector<16x1xf32>
    %126 = math.rsqrt %125 : vector<16x1xf32>
    %127 = vector.broadcast %126 : vector<16x1xf32> to vector<16x32xf32>
    %128 = arith.mulf %123, %127 : vector<16x32xf32>
    %129 = vector.broadcast %5 : vector<1x32xf32> to vector<16x32xf32>
    %130 = arith.mulf %128, %129 : vector<16x32xf32>
    %131 = vector.broadcast %6 : vector<1x32xf32> to vector<16x32xf32>
    %132 = arith.addf %130, %131 : vector<16x32xf32>
    %c0_44 = arith.constant 0 : index
    %c0_45 = arith.constant 0 : index
    %c0_46 = arith.constant 0 : index
    %133 = vector.load %arg4[%c0_44, %c0_45, %c0_46] : memref<2x32x64xf32, #tpu.memory_space<vmem>>, vector<1x32x64xf32>
    %134 = vector.shape_cast %133 : vector<1x32x64xf32> to vector<32x64xf32>
    %cst_47 = arith.constant dense<0.000000e+00> : vector<16x64xf32>
    %135 = tpu.matmul %132, %134, %cst_47 {dimension_numbers = #tpu.dot_dimension_numbers<[1], [0], [0], [1], [0, 0, 1, 1], [], []>} : vector<16x32xf32>, vector<32x64xf32>, vector<16x64xf32> -> vector<16x64xf32>
    %136 = vector.broadcast %10 : vector<1x64xf32> to vector<16x64xf32>
    %137 = arith.addf %135, %136 : vector<16x64xf32>
    %cst_48 = arith.constant 1.702000e+00 : f32
    %138 = vector.broadcast %cst_48 : f32 to vector<16x64xf32>
    %139 = arith.mulf %138, %137 : vector<16x64xf32>
    %140 = arith.negf %139 : vector<16x64xf32>
    %141 = math.exp %140 : vector<16x64xf32>
    %cst_49 = arith.constant 1.000000e+00 : f32
    %142 = vector.broadcast %cst_49 : f32 to vector<16x64xf32>
    %143 = arith.addf %142, %141 : vector<16x64xf32>
    %144 = arith.divf %142, %143 : vector<16x64xf32>
    %145 = arith.mulf %137, %144 : vector<16x64xf32>
    %c0_50 = arith.constant 0 : index
    %c0_51 = arith.constant 0 : index
    %c0_52 = arith.constant 0 : index
    %146 = vector.load %arg5[%c0_50, %c0_51, %c0_52] : memref<2x64x32xf32, #tpu.memory_space<vmem>>, vector<1x64x32xf32>
    %147 = vector.shape_cast %146 : vector<1x64x32xf32> to vector<64x32xf32>
    %cst_53 = arith.constant dense<0.000000e+00> : vector<16x32xf32>
    %148 = tpu.matmul %145, %147, %cst_53 {dimension_numbers = #tpu.dot_dimension_numbers<[1], [0], [0], [1], [0, 0, 1, 1], [], []>} : vector<16x64xf32>, vector<64x32xf32>, vector<16x32xf32> -> vector<16x32xf32>
    %149 = arith.addf %110, %148 : vector<16x32xf32>
    %150 = vector.broadcast %8 : vector<1x32xf32> to vector<16x32xf32>
    %151 = arith.addf %149, %150 : vector<16x32xf32>
    %c8 = arith.constant 8 : index
    %c0_54 = arith.constant 0 : index
    %152 = vector.load %arg1[%c8, %c0_54] : memref<40x128xf32, #tpu.memory_space<vmem>>, vector<1x32xf32>
    %c9 = arith.constant 9 : index
    %c0_55 = arith.constant 0 : index
    %153 = vector.load %arg1[%c9, %c0_55] : memref<40x128xf32, #tpu.memory_space<vmem>>, vector<1x32xf32>
    %c10 = arith.constant 10 : index
    %c0_56 = arith.constant 0 : index
    %154 = vector.load %arg1[%c10, %c0_56] : memref<40x128xf32, #tpu.memory_space<vmem>>, vector<1x32xf32>
    %c11 = arith.constant 11 : index
    %c0_57 = arith.constant 0 : index
    %155 = vector.load %arg1[%c11, %c0_57] : memref<40x128xf32, #tpu.memory_space<vmem>>, vector<1x32xf32>
    %c12 = arith.constant 12 : index
    %c0_58 = arith.constant 0 : index
    %156 = vector.load %arg1[%c12, %c0_58] : memref<40x128xf32, #tpu.memory_space<vmem>>, vector<1x32xf32>
    %c13 = arith.constant 13 : index
    %c0_59 = arith.constant 0 : index
    %157 = vector.load %arg1[%c13, %c0_59] : memref<40x128xf32, #tpu.memory_space<vmem>>, vector<1x32xf32>
    %c14 = arith.constant 14 : index
    %c0_60 = arith.constant 0 : index
    %158 = vector.load %arg1[%c14, %c0_60] : memref<40x128xf32, #tpu.memory_space<vmem>>, vector<1x96xf32>
    %c15 = arith.constant 15 : index
    %c0_61 = arith.constant 0 : index
    %159 = vector.load %arg1[%c15, %c0_61] : memref<40x128xf32, #tpu.memory_space<vmem>>, vector<1x64xf32>
    %cst_62 = arith.constant dense<0.000000e+00> : vector<16xf32>
    %160 = vector.multi_reduction <add>, %151, %cst_62 [1] : vector<16x32xf32> to vector<16xf32>
    %161 = vector.shape_cast %160 : vector<16xf32> to vector<16x1xf32>
    %cst_63 = arith.constant 3.200000e+01 : f32
    %162 = vector.broadcast %cst_63 : f32 to vector<16x1xf32>
    %163 = arith.divf %161, %162 : vector<16x1xf32>
    %164 = vector.broadcast %163 : vector<16x1xf32> to vector<16x32xf32>
    %165 = arith.subf %151, %164 : vector<16x32xf32>
    %166 = arith.mulf %165, %165 : vector<16x32xf32>
    %cst_64 = arith.constant dense<0.000000e+00> : vector<16xf32>
    %167 = vector.multi_reduction <add>, %166, %cst_64 [1] : vector<16x32xf32> to vector<16xf32>
    %168 = vector.shape_cast %167 : vector<16xf32> to vector<16x1xf32>
    %cst_65 = arith.constant 3.200000e+01 : f32
    %169 = vector.broadcast %cst_65 : f32 to vector<16x1xf32>
    %170 = arith.divf %168, %169 : vector<16x1xf32>
    %171 = vector.broadcast %163 : vector<16x1xf32> to vector<16x32xf32>
    %172 = arith.subf %151, %171 : vector<16x32xf32>
    %cst_66 = arith.constant 9.99999974E-6 : f32
    %173 = vector.broadcast %cst_66 : f32 to vector<16x1xf32>
    %174 = arith.addf %170, %173 : vector<16x1xf32>
    %175 = math.rsqrt %174 : vector<16x1xf32>
    %176 = vector.broadcast %175 : vector<16x1xf32> to vector<16x32xf32>
    %177 = arith.mulf %172, %176 : vector<16x32xf32>
    %178 = vector.broadcast %152 : vector<1x32xf32> to vector<16x32xf32>
    %179 = arith.mulf %177, %178 : vector<16x32xf32>
    %180 = vector.broadcast %153 : vector<1x32xf32> to vector<16x32xf32>
    %181 = arith.addf %179, %180 : vector<16x32xf32>
    %c1_67 = arith.constant 1 : index
    %c0_68 = arith.constant 0 : index
    %c0_69 = arith.constant 0 : index
    %182 = vector.load %arg2[%c1_67, %c0_68, %c0_69] : memref<2x32x96xf32, #tpu.memory_space<vmem>>, vector<1x32x96xf32>
    %183 = vector.shape_cast %182 : vector<1x32x96xf32> to vector<32x96xf32>
    %cst_70 = arith.constant dense<0.000000e+00> : vector<16x96xf32>
    %184 = tpu.matmul %181, %183, %cst_70 {dimension_numbers = #tpu.dot_dimension_numbers<[1], [0], [0], [1], [0, 0, 1, 1], [], []>} : vector<16x32xf32>, vector<32x96xf32>, vector<16x96xf32> -> vector<16x96xf32>
    %185 = vector.broadcast %158 : vector<1x96xf32> to vector<16x96xf32>
    %186 = arith.addf %184, %185 : vector<16x96xf32>
    %187 = vector.shape_cast %186 : vector<16x96xf32> to vector<2x8x96xf32>
    %188 = vector.extract_strided_slice %187 {offsets = [0, 0, 0], sizes = [2, 8, 8], strides = [1, 1, 1]} : vector<2x8x96xf32> to vector<2x8x8xf32>
    %189 = vector.extract_strided_slice %187 {offsets = [0, 0, 32], sizes = [2, 8, 8], strides = [1, 1, 1]} : vector<2x8x96xf32> to vector<2x8x8xf32>
    %190 = vector.extract_strided_slice %187 {offsets = [0, 0, 64], sizes = [2, 8, 8], strides = [1, 1, 1]} : vector<2x8x96xf32> to vector<2x8x8xf32>
    "tpu.trace_start"() <{level = 10 : i32, message = "bqd,bkd->bqk"}> : () -> ()
    %cst_71 = arith.constant dense<0.000000e+00> : vector<2x8x8xf32>
    %191 = tpu.matmul %188, %189, %cst_71 {dimension_numbers = #tpu.dot_dimension_numbers<[2], [2], [1], [1], [0, 0, 0, 1, 1, 1], [0], [0]>} : vector<2x8x8xf32>, vector<2x8x8xf32>, vector<2x8x8xf32> -> vector<2x8x8xf32>
    "tpu.trace_stop"() : () -> ()
    %192 = arith.addf %191, %2 : vector<2x8x8xf32>
    %cst_72 = arith.constant dense<0xFF800000> : vector<2x8xf32>
    %193 = vector.multi_reduction <maximumf>, %192, %cst_72 [2] : vector<2x8x8xf32> to vector<2x8xf32>
    %194 = vector.shape_cast %193 : vector<2x8xf32> to vector<2x8x1xf32>
    %195 = vector.broadcast %194 : vector<2x8x1xf32> to vector<2x8x8xf32>
    %196 = arith.subf %192, %195 : vector<2x8x8xf32>
    %197 = math.exp %196 : vector<2x8x8xf32>
    %cst_73 = arith.constant dense<0.000000e+00> : vector<2x8xf32>
    %198 = vector.multi_reduction <add>, %197, %cst_73 [2] : vector<2x8x8xf32> to vector<2x8xf32>
    %199 = vector.shape_cast %198 : vector<2x8xf32> to vector<2x8x1xf32>
    %200 = tpu.reciprocal %199 : vector<2x8x1xf32> -> vector<2x8x1xf32>
    %201 = vector.broadcast %200 : vector<2x8x1xf32> to vector<2x8x8xf32>
    %202 = arith.mulf %197, %201 : vector<2x8x8xf32>
    "tpu.trace_start"() <{level = 10 : i32, message = "bqk,bkd->bqd"}> : () -> ()
    %cst_74 = arith.constant dense<0.000000e+00> : vector<2x8x8xf32>
    %203 = tpu.matmul %202, %190, %cst_74 {dimension_numbers = #tpu.dot_dimension_numbers<[2], [1], [1], [2], [0, 0, 0, 1, 1, 2], [0], [0]>} : vector<2x8x8xf32>, vector<2x8x8xf32>, vector<2x8x8xf32> -> vector<2x8x8xf32>
    "tpu.trace_stop"() : () -> ()
    %204 = vector.extract_strided_slice %187 {offsets = [0, 0, 8], sizes = [2, 8, 8], strides = [1, 1, 1]} : vector<2x8x96xf32> to vector<2x8x8xf32>
    %205 = vector.extract_strided_slice %187 {offsets = [0, 0, 40], sizes = [2, 8, 8], strides = [1, 1, 1]} : vector<2x8x96xf32> to vector<2x8x8xf32>
    %206 = vector.extract_strided_slice %187 {offsets = [0, 0, 72], sizes = [2, 8, 8], strides = [1, 1, 1]} : vector<2x8x96xf32> to vector<2x8x8xf32>
    "tpu.trace_start"() <{level = 10 : i32, message = "bqd,bkd->bqk"}> : () -> ()
    %cst_75 = arith.constant dense<0.000000e+00> : vector<2x8x8xf32>
    %207 = tpu.matmul %204, %205, %cst_75 {dimension_numbers = #tpu.dot_dimension_numbers<[2], [2], [1], [1], [0, 0, 0, 1, 1, 1], [0], [0]>} : vector<2x8x8xf32>, vector<2x8x8xf32>, vector<2x8x8xf32> -> vector<2x8x8xf32>
    "tpu.trace_stop"() : () -> ()
    %208 = arith.addf %207, %2 : vector<2x8x8xf32>
    %cst_76 = arith.constant dense<0xFF800000> : vector<2x8xf32>
    %209 = vector.multi_reduction <maximumf>, %208, %cst_76 [2] : vector<2x8x8xf32> to vector<2x8xf32>
    %210 = vector.shape_cast %209 : vector<2x8xf32> to vector<2x8x1xf32>
    %211 = vector.broadcast %210 : vector<2x8x1xf32> to vector<2x8x8xf32>
    %212 = arith.subf %208, %211 : vector<2x8x8xf32>
    %213 = math.exp %212 : vector<2x8x8xf32>
    %cst_77 = arith.constant dense<0.000000e+00> : vector<2x8xf32>
    %214 = vector.multi_reduction <add>, %213, %cst_77 [2] : vector<2x8x8xf32> to vector<2x8xf32>
    %215 = vector.shape_cast %214 : vector<2x8xf32> to vector<2x8x1xf32>
    %216 = tpu.reciprocal %215 : vector<2x8x1xf32> -> vector<2x8x1xf32>
    %217 = vector.broadcast %216 : vector<2x8x1xf32> to vector<2x8x8xf32>
    %218 = arith.mulf %213, %217 : vector<2x8x8xf32>
    "tpu.trace_start"() <{level = 10 : i32, message = "bqk,bkd->bqd"}> : () -> ()
    %cst_78 = arith.constant dense<0.000000e+00> : vector<2x8x8xf32>
    %219 = tpu.matmul %218, %206, %cst_78 {dimension_numbers = #tpu.dot_dimension_numbers<[2], [1], [1], [2], [0, 0, 0, 1, 1, 2], [0], [0]>} : vector<2x8x8xf32>, vector<2x8x8xf32>, vector<2x8x8xf32> -> vector<2x8x8xf32>
    "tpu.trace_stop"() : () -> ()
    %220 = vector.extract_strided_slice %187 {offsets = [0, 0, 16], sizes = [2, 8, 8], strides = [1, 1, 1]} : vector<2x8x96xf32> to vector<2x8x8xf32>
    %221 = vector.extract_strided_slice %187 {offsets = [0, 0, 48], sizes = [2, 8, 8], strides = [1, 1, 1]} : vector<2x8x96xf32> to vector<2x8x8xf32>
    %222 = vector.extract_strided_slice %187 {offsets = [0, 0, 80], sizes = [2, 8, 8], strides = [1, 1, 1]} : vector<2x8x96xf32> to vector<2x8x8xf32>
    "tpu.trace_start"() <{level = 10 : i32, message = "bqd,bkd->bqk"}> : () -> ()
    %cst_79 = arith.constant dense<0.000000e+00> : vector<2x8x8xf32>
    %223 = tpu.matmul %220, %221, %cst_79 {dimension_numbers = #tpu.dot_dimension_numbers<[2], [2], [1], [1], [0, 0, 0, 1, 1, 1], [0], [0]>} : vector<2x8x8xf32>, vector<2x8x8xf32>, vector<2x8x8xf32> -> vector<2x8x8xf32>
    "tpu.trace_stop"() : () -> ()
    %224 = arith.addf %223, %2 : vector<2x8x8xf32>
    %cst_80 = arith.constant dense<0xFF800000> : vector<2x8xf32>
    %225 = vector.multi_reduction <maximumf>, %224, %cst_80 [2] : vector<2x8x8xf32> to vector<2x8xf32>
    %226 = vector.shape_cast %225 : vector<2x8xf32> to vector<2x8x1xf32>
    %227 = vector.broadcast %226 : vector<2x8x1xf32> to vector<2x8x8xf32>
    %228 = arith.subf %224, %227 : vector<2x8x8xf32>
    %229 = math.exp %228 : vector<2x8x8xf32>
    %cst_81 = arith.constant dense<0.000000e+00> : vector<2x8xf32>
    %230 = vector.multi_reduction <add>, %229, %cst_81 [2] : vector<2x8x8xf32> to vector<2x8xf32>
    %231 = vector.shape_cast %230 : vector<2x8xf32> to vector<2x8x1xf32>
    %232 = tpu.reciprocal %231 : vector<2x8x1xf32> -> vector<2x8x1xf32>
    %233 = vector.broadcast %232 : vector<2x8x1xf32> to vector<2x8x8xf32>
    %234 = arith.mulf %229, %233 : vector<2x8x8xf32>
    "tpu.trace_start"() <{level = 10 : i32, message = "bqk,bkd->bqd"}> : () -> ()
    %cst_82 = arith.constant dense<0.000000e+00> : vector<2x8x8xf32>
    %235 = tpu.matmul %234, %222, %cst_82 {dimension_numbers = #tpu.dot_dimension_numbers<[2], [1], [1], [2], [0, 0, 0, 1, 1, 2], [0], [0]>} : vector<2x8x8xf32>, vector<2x8x8xf32>, vector<2x8x8xf32> -> vector<2x8x8xf32>
    "tpu.trace_stop"() : () -> ()
    %236 = vector.extract_strided_slice %187 {offsets = [0, 0, 24], sizes = [2, 8, 8], strides = [1, 1, 1]} : vector<2x8x96xf32> to vector<2x8x8xf32>
    %237 = vector.extract_strided_slice %187 {offsets = [0, 0, 56], sizes = [2, 8, 8], strides = [1, 1, 1]} : vector<2x8x96xf32> to vector<2x8x8xf32>
    %238 = vector.extract_strided_slice %187 {offsets = [0, 0, 88], sizes = [2, 8, 8], strides = [1, 1, 1]} : vector<2x8x96xf32> to vector<2x8x8xf32>
    "tpu.trace_start"() <{level = 10 : i32, message = "bqd,bkd->bqk"}> : () -> ()
    %cst_83 = arith.constant dense<0.000000e+00> : vector<2x8x8xf32>
    %239 = tpu.matmul %236, %237, %cst_83 {dimension_numbers = #tpu.dot_dimension_numbers<[2], [2], [1], [1], [0, 0, 0, 1, 1, 1], [0], [0]>} : vector<2x8x8xf32>, vector<2x8x8xf32>, vector<2x8x8xf32> -> vector<2x8x8xf32>
    "tpu.trace_stop"() : () -> ()
    %240 = arith.addf %239, %2 : vector<2x8x8xf32>
    %cst_84 = arith.constant dense<0xFF800000> : vector<2x8xf32>
    %241 = vector.multi_reduction <maximumf>, %240, %cst_84 [2] : vector<2x8x8xf32> to vector<2x8xf32>
    %242 = vector.shape_cast %241 : vector<2x8xf32> to vector<2x8x1xf32>
    %243 = vector.broadcast %242 : vector<2x8x1xf32> to vector<2x8x8xf32>
    %244 = arith.subf %240, %243 : vector<2x8x8xf32>
    %245 = math.exp %244 : vector<2x8x8xf32>
    %cst_85 = arith.constant dense<0.000000e+00> : vector<2x8xf32>
    %246 = vector.multi_reduction <add>, %245, %cst_85 [2] : vector<2x8x8xf32> to vector<2x8xf32>
    %247 = vector.shape_cast %246 : vector<2x8xf32> to vector<2x8x1xf32>
    %248 = tpu.reciprocal %247 : vector<2x8x1xf32> -> vector<2x8x1xf32>
    %249 = vector.broadcast %248 : vector<2x8x1xf32> to vector<2x8x8xf32>
    %250 = arith.mulf %245, %249 : vector<2x8x8xf32>
    "tpu.trace_start"() <{level = 10 : i32, message = "bqk,bkd->bqd"}> : () -> ()
    %cst_86 = arith.constant dense<0.000000e+00> : vector<2x8x8xf32>
    %251 = tpu.matmul %250, %238, %cst_86 {dimension_numbers = #tpu.dot_dimension_numbers<[2], [1], [1], [2], [0, 0, 0, 1, 1, 2], [0], [0]>} : vector<2x8x8xf32>, vector<2x8x8xf32>, vector<2x8x8xf32> -> vector<2x8x8xf32>
    "tpu.trace_stop"() : () -> ()
    %252 = tpu.concatenate %203, %219, %235, %251 in 2 : vector<2x8x8xf32>, vector<2x8x8xf32>, vector<2x8x8xf32>, vector<2x8x8xf32> -> vector<2x8x32xf32>
    %253 = vector.shape_cast %252 : vector<2x8x32xf32> to vector<16x32xf32>
    %c1_87 = arith.constant 1 : index
    %c0_88 = arith.constant 0 : index
    %c0_89 = arith.constant 0 : index
    %254 = vector.load %arg3[%c1_87, %c0_88, %c0_89] : memref<2x32x32xf32, #tpu.memory_space<vmem>>, vector<1x32x32xf32>
    %255 = vector.shape_cast %254 : vector<1x32x32xf32> to vector<32x32xf32>
    %cst_90 = arith.constant dense<0.000000e+00> : vector<16x32xf32>
    %256 = tpu.matmul %253, %255, %cst_90 {dimension_numbers = #tpu.dot_dimension_numbers<[1], [0], [0], [1], [0, 0, 1, 1], [], []>} : vector<16x32xf32>, vector<32x32xf32>, vector<16x32xf32> -> vector<16x32xf32>
    %257 = arith.addf %151, %256 : vector<16x32xf32>
    %258 = vector.broadcast %156 : vector<1x32xf32> to vector<16x32xf32>
    %259 = arith.addf %257, %258 : vector<16x32xf32>
    %cst_91 = arith.constant dense<0.000000e+00> : vector<16xf32>
    %260 = vector.multi_reduction <add>, %259, %cst_91 [1] : vector<16x32xf32> to vector<16xf32>
    %261 = vector.shape_cast %260 : vector<16xf32> to vector<16x1xf32>
    %cst_92 = arith.constant 3.200000e+01 : f32
    %262 = vector.broadcast %cst_92 : f32 to vector<16x1xf32>
    %263 = arith.divf %261, %262 : vector<16x1xf32>
    %264 = vector.broadcast %263 : vector<16x1xf32> to vector<16x32xf32>
    %265 = arith.subf %259, %264 : vector<16x32xf32>
    %266 = arith.mulf %265, %265 : vector<16x32xf32>
    %cst_93 = arith.constant dense<0.000000e+00> : vector<16xf32>
    %267 = vector.multi_reduction <add>, %266, %cst_93 [1] : vector<16x32xf32> to vector<16xf32>
    %268 = vector.shape_cast %267 : vector<16xf32> to vector<16x1xf32>
    %cst_94 = arith.constant 3.200000e+01 : f32
    %269 = vector.broadcast %cst_94 : f32 to vector<16x1xf32>
    %270 = arith.divf %268, %269 : vector<16x1xf32>
    %271 = vector.broadcast %263 : vector<16x1xf32> to vector<16x32xf32>
    %272 = arith.subf %259, %271 : vector<16x32xf32>
    %cst_95 = arith.constant 9.99999974E-6 : f32
    %273 = vector.broadcast %cst_95 : f32 to vector<16x1xf32>
    %274 = arith.addf %270, %273 : vector<16x1xf32>
    %275 = math.rsqrt %274 : vector<16x1xf32>
    %276 = vector.broadcast %275 : vector<16x1xf32> to vector<16x32xf32>
    %277 = arith.mulf %272, %276 : vector<16x32xf32>
    %278 = vector.broadcast %154 : vector<1x32xf32> to vector<16x32xf32>
    %279 = arith.mulf %277, %278 : vector<16x32xf32>
    %280 = vector.broadcast %155 : vector<1x32xf32> to vector<16x32xf32>
    %281 = arith.addf %279, %280 : vector<16x32xf32>
    %c1_96 = arith.constant 1 : index
    %c0_97 = arith.constant 0 : index
    %c0_98 = arith.constant 0 : index
    %282 = vector.load %arg4[%c1_96, %c0_97, %c0_98] : memref<2x32x64xf32, #tpu.memory_space<vmem>>, vector<1x32x64xf32>
    %283 = vector.shape_cast %282 : vector<1x32x64xf32> to vector<32x64xf32>
    %cst_99 = arith.constant dense<0.000000e+00> : vector<16x64xf32>
    %284 = tpu.matmul %281, %283, %cst_99 {dimension_numbers = #tpu.dot_dimension_numbers<[1], [0], [0], [1], [0, 0, 1, 1], [], []>} : vector<16x32xf32>, vector<32x64xf32>, vector<16x64xf32> -> vector<16x64xf32>
    %285 = vector.broadcast %159 : vector<1x64xf32> to vector<16x64xf32>
    %286 = arith.addf %284, %285 : vector<16x64xf32>
    %cst_100 = arith.constant 1.702000e+00 : f32
    %287 = vector.broadcast %cst_100 : f32 to vector<16x64xf32>
    %288 = arith.mulf %287, %286 : vector<16x64xf32>
    %289 = arith.negf %288 : vector<16x64xf32>
    %290 = math.exp %289 : vector<16x64xf32>
    %cst_101 = arith.constant 1.000000e+00 : f32
    %291 = vector.broadcast %cst_101 : f32 to vector<16x64xf32>
    %292 = arith.addf %291, %290 : vector<16x64xf32>
    %293 = arith.divf %291, %292 : vector<16x64xf32>
    %294 = arith.mulf %286, %293 : vector<16x64xf32>
    %c1_102 = arith.constant 1 : index
    %c0_103 = arith.constant 0 : index
    %c0_104 = arith.constant 0 : index
    %295 = vector.load %arg5[%c1_102, %c0_103, %c0_104] : memref<2x64x32xf32, #tpu.memory_space<vmem>>, vector<1x64x32xf32>
    %296 = vector.shape_cast %295 : vector<1x64x32xf32> to vector<64x32xf32>
    %cst_105 = arith.constant dense<0.000000e+00> : vector<16x32xf32>
    %297 = tpu.matmul %294, %296, %cst_105 {dimension_numbers = #tpu.dot_dimension_numbers<[1], [0], [0], [1], [0, 0, 1, 1], [], []>} : vector<16x64xf32>, vector<64x32xf32>, vector<16x32xf32> -> vector<16x32xf32>
    %298 = arith.addf %259, %297 : vector<16x32xf32>
    %299 = vector.broadcast %157 : vector<1x32xf32> to vector<16x32xf32>
    %300 = arith.addf %298, %299 : vector<16x32xf32>
    %c1_106 = arith.constant 1 : index
    %c0_107 = arith.constant 0 : index
    %c0_108 = arith.constant 0 : index
    %301 = vector.load %arg6[%c1_106, %c0_107, %c0_108] : memref<2x16x32xf32, #tpu.memory_space<vmem>>, vector<1x16x32xf32>
    %302 = vector.shape_cast %301 : vector<1x16x32xf32> to vector<16x32xf32>
    %303 = vector.shape_cast %300 : vector<16x32xf32> to vector<1x16x32xf32>
    tpu.vector_store %arg6[%c1_106, %c0_107, %c0_108], %303 {strides = array<i32>} : memref<2x16x32xf32, #tpu.memory_space<vmem>>, vector<1x16x32xf32>,
    %c16 = arith.constant 16 : index
    %c0_109 = arith.constant 0 : index
    %304 = vector.load %arg1[%c16, %c0_109] : memref<40x128xf32, #tpu.memory_space<vmem>>, vector<1x32xf32>
    %c17 = arith.constant 17 : index
    %c0_110 = arith.constant 0 : index
    %305 = vector.load %arg1[%c17, %c0_110] : memref<40x128xf32, #tpu.memory_space<vmem>>, vector<1x32xf32>
    %cst_111 = arith.constant dense<0.000000e+00> : vector<16xf32>
    %306 = vector.multi_reduction <add>, %300, %cst_111 [1] : vector<16x32xf32> to vector<16xf32>
    %307 = vector.shape_cast %306 : vector<16xf32> to vector<16x1xf32>
    %cst_112 = arith.constant 3.200000e+01 : f32
    %308 = vector.broadcast %cst_112 : f32 to vector<16x1xf32>
    %309 = arith.divf %307, %308 : vector<16x1xf32>
    %310 = vector.broadcast %309 : vector<16x1xf32> to vector<16x32xf32>
    %311 = arith.subf %300, %310 : vector<16x32xf32>
    %312 = arith.mulf %311, %311 : vector<16x32xf32>
    %cst_113 = arith.constant dense<0.000000e+00> : vector<16xf32>
    %313 = vector.multi_reduction <add>, %312, %cst_113 [1] : vector<16x32xf32> to vector<16xf32>
    %314 = vector.shape_cast %313 : vector<16xf32> to vector<16x1xf32>
    %cst_114 = arith.constant 3.200000e+01 : f32
    %315 = vector.broadcast %cst_114 : f32 to vector<16x1xf32>
    %316 = arith.divf %314, %315 : vector<16x1xf32>
    %317 = vector.broadcast %309 : vector<16x1xf32> to vector<16x32xf32>
    %318 = arith.subf %300, %317 : vector<16x32xf32>
    %cst_115 = arith.constant 9.99999974E-6 : f32
    %319 = vector.broadcast %cst_115 : f32 to vector<16x1xf32>
    %320 = arith.addf %316, %319 : vector<16x1xf32>
    %321 = math.rsqrt %320 : vector<16x1xf32>
    %322 = vector.broadcast %321 : vector<16x1xf32> to vector<16x32xf32>
    %323 = arith.mulf %318, %322 : vector<16x32xf32>
    %324 = vector.broadcast %304 : vector<1x32xf32> to vector<16x32xf32>
    %325 = arith.mulf %323, %324 : vector<16x32xf32>
    %326 = vector.broadcast %305 : vector<1x32xf32> to vector<16x32xf32>
    %327 = arith.addf %325, %326 : vector<16x32xf32>
    %c0_116 = arith.constant 0 : index
    %c0_117 = arith.constant 0 : index
    %c0_118 = arith.constant 0 : index
    %328 = vector.load %arg6[%c0_116, %c0_117, %c0_118] : memref<2x16x32xf32, #tpu.memory_space<vmem>>, vector<1x16x32xf32>
    %329 = vector.shape_cast %328 : vector<1x16x32xf32> to vector<16x32xf32>
    %330 = vector.shape_cast %327 : vector<16x32xf32> to vector<1x16x32xf32>
    tpu.vector_store %arg6[%c0_116, %c0_117, %c0_118], %330 {strides = array<i32>} : memref<2x16x32xf32, #tpu.memory_space<vmem>>, vector<1x16x32xf32>,
    return
  }
}

</mosaic_0001>

<bundles_post_ra>
// kernel: clip_text_forward.1
= control target key start
LH: loop header
LB: loop body
LE: loop exit
PB: predicated region body
PF: predicated region fallthrough
CT: control target
= control target key end

     0   :  { %vm35_vm0 = vcmask 261120   ;;  %v4408_v36 = vmov 0.0   ;;  %vm4409_vm1 = vmmov 0   ;;  %s4410_s14 = smov 96   ;;  %vm167_vm2 = vcmask 64512   ;;  %s4411_s19 = smov 64   ;;  %s5091_s0 = inlined_call_operand.vmem [shape: f32[16,32], index: 0, kind: input, shape index: {}]   ;;  %s5092_s2 = inlined_call_operand.vmem [shape: f32[2,32,96], index: 2, kind: input, shape index: {}]   ;;  %s5093_s1 = inlined_call_operand.vmem [shape: f32[40,128], index: 1, kind: input, shape index: {}]   ;;  %s5094_s3 = inlined_call_operand.vmem [shape: f32[2,32,32], index: 3, kind: input, shape index: {}]   ;;  %s5095_s4 = inlined_call_operand.vmem [shape: f32[2,32,64], index: 4, kind: input, shape index: {}]   ;;  %s5096_s5 = inlined_call_operand.vmem [shape: f32[2,64,32], index: 5, kind: input, shape index: {}]   ;;  %s5097_s6 = inlined_call_operand.vmem [shape: f32[2,16,32], index: 6, kind: output, shape index: {}]  }
   0x1   :  { %v4462_v0 = vld [vmem:[%s5091_s0] sm:$0xff]  ;;  %v4467_v1 = vld [vmem:[%s5091_s0 + $0x8] sm:$0xff]  ;;  %v77_v16 = vld [vmem:[%s5092_s2 + $0x10] sm:$0xff]  ;;  %3967 = vmatprep.subr.mxu0 %v4408_v36  ;;  %3969 = vmatprep.mubr.msk.f32.mxu0 %vm4409_vm1, %v4408_v36  ;;  %s4412_s20 = smov 88   ;;  %s4413_s21 = smov 120   ;;  %vm1512_vm3 = vcmask 195584  }
   0x2   :  { %v36_v2 = vsel %vm35_vm0, %v4462_v0, 0.0  ;;  %v39_v3 = vsel %vm35_vm0, %v4467_v1, 0.0  ;;  %v75_v14 = vld [vmem:[%s5092_s2] sm:$0xff]  ;;  %v76_v15 = vld [vmem:[%s5092_s2 + $0x8] sm:$0xff]  ;;  %v78_v18 = vld [vmem:[%s5092_s2 + $0x18] sm:$0xff]  ;;  %s4414_s22 = smov 56  }
   0x3   :  { %37 = vadd.xlane.f32.xlu0 %v36_v2  ;;  %v4210_v17 = vpack.c.bf16 %v76_v15, %v75_v14  ;;  %v4214_v19 = vpack.c.bf16 %v78_v18, %v77_v16  ;;  %v3718_v27 = vld [vmem:[%s5093_s1] ss:$0 sm:$0xff]  ;;  %v3719_v29 = vld [vmem:[%s5093_s1 + $0x1] ss:$0 sm:$0xff]  ;;  %v3720_v37 = vld [vmem:[%s5093_s1 + $0x6] ss:$0 sm:$0xff] }
   0x4   :  { %v4529_v44 = vld [vmem:[%s5093_s1 + $0x18] sm:$0xff]  ;;  %v4535_v48 = vld [vmem:[%s5093_s1 + $0x20] sm:$0xff]  ;;  %s4415_s23 = smov 80   ;;  %s4416_s24 = smov 112   ;;  %vm1509_vm4 = vcmask 130048   ;;  %vm1759_vm5 = vcmask 523264  }
   0x5   :  { %4211 = vmatprep.subr.bf16.mxu1 %v4210_v17  ;;  %s4417_s0 = smov 48   ;;  %s4418_s25 = smov 72  }
   0x6   :  { %4213 = vmatpush3.bf16.msra.mxu1 %v4210_v17  ;;  %s4419_s26 = smov 104   ;;  %s4420_s27 = smov 40  }
   0x7   :  { %40 = vadd.xlane.f32.xlu0 %v39_v3  ;;  %4215 = vmatprep.subr.bf16.mxu1 %v4214_v19  ;;  %s4421_s28 = smov 8   ;;  %s4422_s29 = smov 16  }
   0x8   :  { %s4423_s15 = smov 24  }
   0xa   :  { %4217 = vmatpush3.bf16.msra.mxu1 %v4214_v19 }
   0xb   :  { %3957 = vmatprep.subr.mxu1 %v4408_v36 }
  0x90   :  { %v38_v4 = vpop.xlane.xlu0 %37 }
  0x91   :  { %v43_v5 = vmul.f32 0.03125, %v38_v4 }
  0x93   :  { %v45_v6 = vsub.f32 %v4462_v0, %v43_v5 }
  0x94   :  { %v41_v7 = vpop.xlane.xlu0 %40 }
  0x95   :  { %v44_v8 = vmul.f32 0.03125, %v41_v7  ;;  %v47_v9 = vmul.f32 %v45_v6, %v45_v6 }
  0x97   :  { %v46_v10 = vsub.f32 %v4467_v1, %v44_v8  ;;  %v49_v11 = vsel %vm35_vm0, %v47_v9, 0.0 }
  0x98   :  { %50 = vadd.xlane.f32.xlu1 %v49_v11 }
  0x99   :  { %v48_v12 = vmul.f32 %v46_v10, %v46_v10 }
  0x9b   :  { %v52_v13 = vsel %vm35_vm0, %v48_v12, 0.0 }
  0x9c   :  { %53 = vadd.xlane.f32.xlu1 %v52_v13 }
 0x125   :  { %v51_v20 = vpop.xlane.xlu1 %50 }
 0x126   :  { %v55_v21 = vmul.f32 0.03125, %v51_v20 }
 0x128   :  { %v57_v22 = vadd.f32 1e-05, %v55_v21 }
 0x129   :  { %v54_v23 = vpop.xlane.xlu1 %53 }
 0x12a   :  { %4306 = vrsqrt.f32 %v57_v22  ;;  %v56_v24 = vmul.f32 0.03125, %v54_v23 }
 0x12c   :  { %v58_v25 = vadd.f32 1e-05, %v56_v24 }
 0x12e   :  { %4308 = vrsqrt.f32 %v58_v25 }
 0x134   :  { %v4307_v26 = vpop.eup %4306 }
 0x135   :  { %v61_v28 = vmul.f32 %v4307_v26, %v45_v6 }
 0x137   :  { %v67_v30 = vmul.f32 %v3718_v27, %v61_v28 }
 0x138   :  { %v4309_v31 = vpop.eup %4308 }
 0x139   :  { %v62_v32 = vmul.f32 %v4309_v31, %v46_v10  ;;  %v73_v33 = vadd.f32 %v3719_v29, %v67_v30 }
 0x13b   :  { %v68_v34 = vmul.f32 %v3718_v27, %v62_v32  ;;  %3954 = vmatprep.mubr.msk.f32.mxu1 %vm35_vm0, %v73_v33 }
 0x13d   :  { %v74_v35 = vadd.f32 %v3719_v29, %v68_v34 }
 0x13f   :  { %3955 = vmatmul.mubr.msk.f32.vlgmr.msra.gmra.mrb[0].mxu1 %vm35_vm0, %v74_v35 }
 0x140   :  { %3959 = vmatprep.mubr.msk.f32.mxu1 %vm4409_vm1, %v4408_v36 }
 0x212   :  { %v3956_v38 = vpop.f32.mrb[0].mxu1 }
 0x213   :  { %v4506_v39 = vadd.f32 %v3956_v38, %v3720_v37  ;;  %v155_v40 = vpop.f32.mrb[1].mxu1 }
 0x214   :  { %v4508_v41 = vadd.f32 %v3720_v37, %v155_v40 }
 0x215   :  { %243 = vrot.lane.b32.xlu1 %v4506_v39, %s4410_s14 }
 0x216   :  { %165 = vrot.lane.b32.xlu0 %v4508_v41, %s4410_s14 }
 0x287   :  { %v244_v43 = vpop.permute.xlu1 %243 }
 0x288   :  { %v166_v42 = vpop.permute.xlu0 %165 }
 0x289   :  { %3958 = vmatpush3.xpose.msk.msra.mxu1 %vm167_vm2, %v166_v42 }
 0x28a   :  { %3962 = vmatprep.subr.mxu1 %v4408_v36 }
 0x28c   :  { %3960 = vmatmul.mubr.msk.f32.vlgmr.msra.gmra.mrb[2].mxu1 %vm167_vm2, %v4508_v41 }
 0x28d   :  { %3963 = vmatpush3.xpose.msk.msra.mxu1 %vm167_vm2, %v244_v43  ;;  %3964 = vmatprep.mubr.msk.f32.mxu1 %vm4409_vm1, %v4408_v36 }
 0x28e   :  { %3972 = vmatprep.subr.mxu1 %v4408_v36 }
 0x290   :  { %3965 = vmatmul.mubr.msk.f32.vlgmr.msra.gmra.mrb[4].mxu1 %vm167_vm2, %v4506_v39 }
 0x291   :  { %3974 = vmatprep.mubr.msk.f32.mxu1 %vm4409_vm1, %v4408_v36 }
 0x35f   :  { %v238_v45 = vpop.f32.mrb[2].mxu1 }
 0x360   :  { %v239_v46 = vadd.f32 %v238_v45, %v4529_v44  ;;  %v3961_v47 = vpop.f32.mrb[3].mxu1 }
 0x362   :  { %v319_v49 = vsel %vm167_vm2, %v239_v46, -inf }
 0x363   :  { %320 = vmax.xlane.f32.xlu1 %v319_v49  ;;  %v315_v50 = vpop.f32.mrb[4].mxu1 }
 0x364   :  { %v316_v51 = vadd.f32 %v315_v50, %v4535_v48  ;;  %v3966_v52 = vpop.f32.mrb[5].mxu1 }
 0x366   :  { %v322_v53 = vsel %vm167_vm2, %v316_v51, -inf }
 0x367   :  { %323 = vmax.xlane.f32.xlu0 %v322_v53 }
 0x374   :  { %417 = vrot.lane.b32.xlu1 %v4506_v39, %s4411_s19 }
 0x378   :  { %495 = vrot.lane.b32.xlu1 %v4508_v41, %s4412_s20 }
 0x37c   :  { %573 = vrot.lane.b32.xlu1 %v4506_v39, %s4412_s20 }
 0x37d   :  { %341 = vrot.lane.b32.xlu0 %v4508_v41, %s4411_s19 }
 0x3f0   :  { %v321_v54 = vpop.xlane.xlu1 %320 }
 0x3f1   :  { %v325_v55 = vsub.f32 %v239_v46, %v321_v54 }
 0x3f3   :  { %v327_v56 = vmul.f32 1.442695, %v325_v55 }
 0x3f4   :  { %v418_v57 = vpop.permute.xlu1 %417  ;;  %v324_v58 = vpop.xlane.xlu0 %323 }
 0x3f5   :  { %4310 = vpow2.f32 %v327_v56  ;;  %v326_v59 = vsub.f32 %v316_v51, %v324_v58  ;;  %3973 = vmatpush3.msra.mxu1 %v418_v57 }
 0x3f6   :  { %3982 = vmatprep.subr.mxu1 %v4408_v36 }
 0x3f7   :  { %v329_v60 = vmul.f32 1.442695, %v326_v59 }
 0x3f8   :  { %v342_v61 = vpop.permute.xlu0 %341  ;;  %v496_v4 = vpop.permute.xlu1 %495 }
 0x3f9   :  { %4312 = vpow2.f32 %v329_v60  ;;  %3968 = vmatpush3.msra.mxu0 %v342_v61 }
 0x3fa   :  { %3977 = vmatprep.subr.mxu0 %v4408_v36 }
 0x3fc   :  { %v574_v5 = vpop.permute.xlu1 %573 }
 0x3ff   :  { %v4311_v62 = vpop.eup %4310 }
 0x400   :  { %v331_v63 = vsel %vm167_vm2, %v4311_v62, 0.0 }
 0x401   :  { %332 = vadd.xlane.f32.xlu0 %v331_v63 }
 0x403   :  { %v4313_v2 = vpop.eup %4312 }
 0x404   :  { %v334_v3 = vsel %vm167_vm2, %v4313_v2, 0.0 }
 0x405   :  { %335 = vadd.xlane.f32.xlu1 %v334_v3 }
 0x416   :  { %571 = vrot.lane.b32.xlu1 %v4506_v39, %s4413_s21 }
 0x417   :  { %493 = vrot.lane.b32.xlu0 %v4508_v41, %s4413_s21 }
 0x48e   :  { %v333_v6 = vpop.xlane.xlu0 %332 }
 0x48f   :  { %4314 = vrcp.f32 %v333_v6 }
 0x492   :  { %v336_v7 = vpop.xlane.xlu1 %335  ;;  %v494_v12 = vpop.permute.xlu0 %493 }
 0x493   :  { %4316 = vrcp.f32 %v336_v7 }
 0x496   :  { %v572_v13 = vpop.permute.xlu1 %571 }
 0x499   :  { %v4315_v8 = vpop.eup %4314 }
 0x49a   :  { %v339_v9 = vmul.f32 %v4315_v8, %v4311_v62 }
 0x49c   :  { %3970 = vmatmul.mubr.msk.f32.vlgmr.msra.gmra.mrb[0].mxu0 %vm167_vm2, %v339_v9 }
 0x49d   :  { %v4317_v10 = vpop.eup %4316  ;;  %3978 = vmatpush3.xpose.msk.msra.mxu0 %vm167_vm2, %v496_v4  ;;  %3979 = vmatprep.mubr.msk.f32.mxu0 %vm4409_vm1, %v4408_v36 }
 0x49e   :  { %v340_v11 = vmul.f32 %v4317_v10, %v4313_v2  ;;  %3987 = vmatprep.subr.mxu0 %v4408_v36 }
 0x4a0   :  { %3975 = vmatmul.mubr.msk.f32.vlgmr.msra.gmra.mrb[6].mxu1 %vm167_vm2, %v340_v11  ;;  %3980 = vmatmul.mubr.msk.f32.vlgmr.msra.gmra.mrb[2].mxu0 %vm167_vm2, %v494_v12 }
 0x4a1   :  { %3983 = vmatpush3.xpose.msk.msra.mxu1 %vm167_vm2, %v574_v5  ;;  %3984 = vmatprep.mubr.msk.f32.mxu1 %vm4409_vm1, %v4408_v36 }
 0x4a2   :  { %3992 = vmatprep.subr.mxu1 %v4408_v36  ;;  %3989 = vmatprep.mubr.msk.f32.mxu0 %vm4409_vm1, %v4408_v36 }
 0x4a4   :  { %3985 = vmatmul.mubr.msk.f32.vlgmr.msra.gmra.mrb[8].mxu1 %vm167_vm2, %v572_v13 }
 0x4a5   :  { %3994 = vmatprep.mubr.msk.f32.mxu1 %vm4409_vm1, %v4408_v36 }
 0x56f   :  { %v4572_v14 = vpop.f32.mrb[0].mxu0 }
 0x570   :  { %v3971_v15 = vpop.f32.mrb[1].mxu0 }
 0x573   :  { %v4574_v16 = vpop.f32.mrb[6].mxu1  ;;  %v567_v17 = vpop.f32.mrb[2].mxu0 }
 0x574   :  { %v568_v18 = vadd.f32 %v567_v17, %v4529_v44  ;;  %v3976_v19 = vpop.f32.mrb[7].mxu1  ;;  %v3981_v20 = vpop.f32.mrb[3].mxu0 }
 0x576   :  { %v649_v21 = vsel %vm167_vm2, %v568_v18, -inf }
 0x577   :  { %650 = vmax.xlane.f32.xlu0 %v649_v21  ;;  %v645_v22 = vpop.f32.mrb[8].mxu1 }
 0x578   :  { %v646_v23 = vadd.f32 %v645_v22, %v4535_v48  ;;  %v3986_v24 = vpop.f32.mrb[9].mxu1 }
 0x57a   :  { %v652_v25 = vsel %vm167_vm2, %v646_v23, -inf }
 0x57b   :  { %653 = vmax.xlane.f32.xlu1 %v652_v25 }
 0x58c   :  { %747 = vrot.lane.b32.xlu1 %v4506_v39, %s4414_s22 }
 0x58d   :  { %671 = vrot.lane.b32.xlu0 %v4508_v41, %s4414_s22 }
 0x590   :  { %825 = vrot.lane.b32.xlu1 %v4508_v41, %s4415_s23 }
 0x594   :  { %903 = vrot.lane.b32.xlu1 %v4506_v39, %s4415_s23 }
 0x598   :  { %901 = vrot.lane.b32.xlu1 %v4506_v39, %s4416_s24 }
 0x604   :  { %v651_v26 = vpop.xlane.xlu0 %650 }
 0x605   :  { %v655_v27 = vsub.f32 %v568_v18, %v651_v26 }
 0x607   :  { %v657_v28 = vmul.f32 1.442695, %v655_v27 }
 0x608   :  { %v672_v29 = vpop.permute.xlu0 %671  ;;  %v654_v30 = vpop.xlane.xlu1 %653 }
 0x609   :  { %4318 = vpow2.f32 %v657_v28  ;;  %v656_v31 = vsub.f32 %v646_v23, %v654_v30  ;;  %3988 = vmatpush3.msra.mxu0 %v672_v29 }
 0x60a   :  { %3997 = vmatprep.subr.mxu0 %v4408_v36 }
 0x60b   :  { %v659_v32 = vmul.f32 1.442695, %v656_v31 }
 0x60c   :  { %v748_v33 = vpop.permute.xlu1 %747 }
 0x60d   :  { %4320 = vpow2.f32 %v659_v32  ;;  %3993 = vmatpush3.msra.mxu1 %v748_v33 }
 0x60e   :  { %4002 = vmatprep.subr.mxu1 %v4408_v36 }
 0x610   :  { %v826_v43 = vpop.permute.xlu1 %825 }
 0x613   :  { %v4319_v34 = vpop.eup %4318 }
 0x614   :  { %v661_v35 = vsel %vm167_vm2, %v4319_v34, 0.0  ;;  %v904_v49 = vpop.permute.xlu1 %903 }
 0x615   :  { %662 = vadd.xlane.f32.xlu0 %v661_v35 }
 0x617   :  { %v4321_v37 = vpop.eup %4320 }
 0x618   :  { %v664_v38 = vsel %vm167_vm2, %v4321_v37, 0.0  ;;  %v902_v52 = vpop.permute.xlu1 %901 }
 0x619   :  { %665 = vadd.xlane.f32.xlu0 %v664_v38 }
 0x62f   :  { %823 = vrot.lane.b32.xlu0 %v4508_v41, %s4416_s24 }
 0x6a2   :  { %v663_v40 = vpop.xlane.xlu0 %662 }
 0x6a3   :  { %4322 = vrcp.f32 %v663_v40 }
 0x6a6   :  { %v666_v42 = vpop.xlane.xlu0 %665 }
 0x6a7   :  { %4324 = vrcp.f32 %v666_v42 }
 0x6aa   :  { %v824_v51 = vpop.permute.xlu0 %823 }
 0x6ad   :  { %v4323_v45 = vpop.eup %4322 }
 0x6ae   :  { %v669_v46 = vmul.f32 %v4323_v45, %v4319_v34 }
 0x6b0   :  { %3990 = vmatmul.mubr.msk.f32.vlgmr.msra.gmra.mrb[4].mxu0 %vm167_vm2, %v669_v46 }
 0x6b1   :  { %v4325_v47 = vpop.eup %4324  ;;  %3998 = vmatpush3.xpose.msk.msra.mxu0 %vm167_vm2, %v826_v43  ;;  %3999 = vmatprep.mubr.msk.f32.mxu0 %vm4409_vm1, %v4408_v36 }
 0x6b2   :  { %v670_v50 = vmul.f32 %v4325_v47, %v4321_v37  ;;  %4007 = vmatprep.subr.mxu0 %v4408_v36 }
 0x6b4   :  { %3995 = vmatmul.mubr.msk.f32.vlgmr.msra.gmra.mrb[10].mxu1 %vm167_vm2, %v670_v50  ;;  %4000 = vmatmul.mubr.msk.f32.vlgmr.msra.gmra.mrb[6].mxu0 %vm167_vm2, %v824_v51 }
 0x6b5   :  { %4003 = vmatpush3.xpose.msk.msra.mxu1 %vm167_vm2, %v904_v49  ;;  %4004 = vmatprep.mubr.msk.f32.mxu1 %vm4409_vm1, %v4408_v36 }
 0x6b6   :  { %4012 = vmatprep.subr.mxu1 %v4408_v36  ;;  %4009 = vmatprep.mubr.msk.f32.mxu0 %vm4409_vm1, %v4408_v36 }
 0x6b8   :  { %4005 = vmatmul.mubr.msk.f32.vlgmr.msra.gmra.mrb[12].mxu1 %vm167_vm2, %v902_v52 }
 0x6b9   :  { %4014 = vmatprep.mubr.msk.f32.mxu1 %vm4409_vm1, %v4408_v36 }
 0x783   :  { %v4612_v53 = vpop.f32.mrb[4].mxu0 }
 0x784   :  { %v3991_v54 = vpop.f32.mrb[5].mxu0 }
 0x787   :  { %v4614_v55 = vpop.f32.mrb[10].mxu1  ;;  %v897_v56 = vpop.f32.mrb[6].mxu0 }
 0x788   :  { %v898_v57 = vadd.f32 %v897_v56, %v4529_v44  ;;  %v3996_v58 = vpop.f32.mrb[11].mxu1  ;;  %v4001_v59 = vpop.f32.mrb[7].mxu0 }
 0x78a   :  { %v979_v60 = vsel %vm167_vm2, %v898_v57, -inf }
 0x78b   :  { %980 = vmax.xlane.f32.xlu0 %v979_v60  ;;  %v975_v61 = vpop.f32.mrb[12].mxu1 }
 0x78c   :  { %v976_v62 = vadd.f32 %v975_v61, %v4535_v48  ;;  %v4006_v63 = vpop.f32.mrb[13].mxu1  ;;  %v1516_v61 = vld [vmem:[%s5094_s3 + $0x8] sm:$0xff] }
 0x78d   :  { %v1517_v63 = vld [vmem:[%s5094_s3 + $0x10] sm:$0xff] }
 0x78e   :  { %v982_v2 = vsel %vm167_vm2, %v976_v62, -inf }
 0x78f   :  { %983 = vmax.xlane.f32.xlu1 %v982_v2  ;;  %v1518_v2 = vld [vmem:[%s5094_s3 + $0x18] sm:$0xff] }
 0x7a0   :  { %1077 = vrot.lane.b32.xlu1 %v4506_v39, %s4417_s0 }
 0x7a1   :  { %1001 = vrot.lane.b32.xlu0 %v4508_v41, %s4417_s0 }
 0x7a4   :  { %1155 = vrot.lane.b32.xlu1 %v4508_v41, %s4418_s25 }
 0x7a8   :  { %1233 = vrot.lane.b32.xlu1 %v4506_v39, %s4418_s25 }
 0x7ac   :  { %1231 = vrot.lane.b32.xlu1 %v4506_v39, %s4419_s26 }
 0x818   :  { %v981_v3 = vpop.xlane.xlu0 %980 }
 0x819   :  { %v985_v4 = vsub.f32 %v898_v57, %v981_v3  ;;  %v4222_v3 = vpack.c.bf16 %v1518_v2, %v1517_v63  ;;  %v1752_v63 = vld [vmem:[%s5096_s5 + $0x8] sm:$0xff] }
 0x81b   :  { %v987_v5 = vmul.f32 1.442695, %v985_v4 }
 0x81c   :  { %v1002_v6 = vpop.permute.xlu0 %1001  ;;  %v984_v7 = vpop.xlane.xlu1 %983 }
 0x81d   :  { %4326 = vpow2.f32 %v987_v5  ;;  %v986_v8 = vsub.f32 %v976_v62, %v984_v7  ;;  %4008 = vmatpush3.msra.mxu0 %v1002_v6 }
 0x81e   :  { %4017 = vmatprep.subr.mxu0 %v4408_v36 }
 0x81f   :  { %v989_v9 = vmul.f32 1.442695, %v986_v8 }
 0x820   :  { %v1078_v10 = vpop.permute.xlu1 %1077 }
 0x821   :  { %4328 = vpow2.f32 %v989_v9  ;;  %4013 = vmatpush3.msra.mxu1 %v1078_v10 }
 0x822   :  { %4022 = vmatprep.subr.mxu1 %v4408_v36 }
 0x824   :  { %v1156_v19 = vpop.permute.xlu1 %1155 }
 0x827   :  { %v4327_v11 = vpop.eup %4326 }
 0x828   :  { %v991_v12 = vsel %vm167_vm2, %v4327_v11, 0.0  ;;  %v1234_v23 = vpop.permute.xlu1 %1233 }
 0x829   :  { %992 = vadd.xlane.f32.xlu0 %v991_v12 }
 0x82b   :  { %v4329_v13 = vpop.eup %4328 }
 0x82c   :  { %v994_v15 = vsel %vm167_vm2, %v4329_v13, 0.0  ;;  %v1232_v26 = vpop.permute.xlu1 %1231 }
 0x82d   :  { %995 = vadd.xlane.f32.xlu0 %v994_v15 }
 0x843   :  { %1153 = vrot.lane.b32.xlu0 %v4508_v41, %s4419_s26 }
 0x8b6   :  { %v993_v17 = vpop.xlane.xlu0 %992 }
 0x8b7   :  { %4330 = vrcp.f32 %v993_v17 }
 0x8ba   :  { %v996_v18 = vpop.xlane.xlu0 %995 }
 0x8bb   :  { %4332 = vrcp.f32 %v996_v18 }
 0x8be   :  { %v1154_v25 = vpop.permute.xlu0 %1153 }
 0x8c1   :  { %v4331_v20 = vpop.eup %4330 }
 0x8c2   :  { %v999_v21 = vmul.f32 %v4331_v20, %v4327_v11 }
 0x8c4   :  { %4010 = vmatmul.mubr.msk.f32.vlgmr.msra.gmra.mrb[8].mxu0 %vm167_vm2, %v999_v21 }
 0x8c5   :  { %v4333_v22 = vpop.eup %4332  ;;  %4018 = vmatpush3.xpose.msk.msra.mxu0 %vm167_vm2, %v1156_v19  ;;  %4019 = vmatprep.mubr.msk.f32.mxu0 %vm4409_vm1, %v4408_v36 }
 0x8c6   :  { %v1000_v24 = vmul.f32 %v4333_v22, %v4329_v13  ;;  %4027 = vmatprep.subr.mxu0 %v4408_v36 }
 0x8c8   :  { %4015 = vmatmul.mubr.msk.f32.vlgmr.msra.gmra.mrb[14].mxu1 %vm167_vm2, %v1000_v24  ;;  %4020 = vmatmul.mubr.msk.f32.vlgmr.msra.gmra.mrb[10].mxu0 %vm167_vm2, %v1154_v25 }
 0x8c9   :  { %4023 = vmatpush3.xpose.msk.msra.mxu1 %vm167_vm2, %v1234_v23  ;;  %4024 = vmatprep.mubr.msk.f32.mxu1 %vm4409_vm1, %v4408_v36 }
 0x8ca   :  { %4032 = vmatprep.subr.mxu1 %v4408_v36  ;;  %4029 = vmatprep.mubr.msk.f32.mxu0 %vm4409_vm1, %v4408_v36 }
 0x8cc   :  { %4025 = vmatmul.mubr.msk.f32.vlgmr.msra.gmra.mrb[16].mxu1 %vm167_vm2, %v1232_v26 }
 0x8cd   :  { %4034 = vmatprep.mubr.msk.f32.mxu1 %vm4409_vm1, %v4408_v36 }
 0x997   :  { %v1073_v27 = vpop.f32.mrb[8].mxu0 }
 0x998   :  { %v4011_v28 = vpop.f32.mrb[9].mxu0 }
 0x99b   :  { %v1149_v29 = vpop.f32.mrb[14].mxu1  ;;  %v1227_v30 = vpop.f32.mrb[10].mxu0 }
 0x99c   :  { %v1228_v31 = vadd.f32 %v1227_v30, %v4529_v44  ;;  %v4016_v32 = vpop.f32.mrb[15].mxu1  ;;  %v4021_v33 = vpop.f32.mrb[11].mxu0 }
 0x99e   :  { %v1309_v34 = vsel %vm167_vm2, %v1228_v31, -inf }
 0x99f   :  { %1310 = vmax.xlane.f32.xlu0 %v1309_v34  ;;  %v1305_v35 = vpop.f32.mrb[16].mxu1 }
 0x9a0   :  { %v1306_v37 = vadd.f32 %v1305_v35, %v4535_v48  ;;  %v4026_v38 = vpop.f32.mrb[17].mxu1 }
 0x9a1   :  { %v1646_v38 = vld [vmem:[%s5095_s4] sm:$0xff] }
 0x9a2   :  { %v1312_v40 = vsel %vm167_vm2, %v1306_v37, -inf }
 0x9a3   :  { %1313 = vmax.xlane.f32.xlu1 %v1312_v40  ;;  %v1647_v40 = vld [vmem:[%s5095_s4 + $0x8] sm:$0xff] }
 0x9b4   :  { %1407 = vrot.lane.b32.xlu1 %v4506_v39, %s4420_s27 }
 0x9b8   :  { %1485 = vrot.lane.b32.xlu1 %v4612_v53, %s4421_s28 }
 0x9bc   :  { %1487 = vrot.lane.b32.xlu1 %v4614_v55, %s4421_s28 }
 0x9c0   :  { %1495 = vrot.lane.b32.xlu1 %v1149_v29, %s4422_s29 }
 0xa2c   :  { %v1311_v42 = vpop.xlane.xlu0 %1310 }
 0xa2d   :  { %v1315_v43 = vsub.f32 %v1228_v31, %v1311_v42  ;;  %v4226_v42 = vpack.c.bf16 %v1647_v40, %v1646_v38 }
 0xa2f   :  { %v1317_v45 = vmul.f32 1.442695, %v1315_v43  ;;  %v1648_v43 = vld [vmem:[%s5095_s4 + $0x10] sm:$0xff] }
 0xa30   :  { %v1314_v46 = vpop.xlane.xlu1 %1313 }
 0xa31   :  { %4334 = vpow2.f32 %v1317_v45  ;;  %v1316_v47 = vsub.f32 %v1306_v37, %v1314_v46  ;;  %v1649_v45 = vld [vmem:[%s5095_s4 + $0x18] sm:$0xff] }
 0xa32   :  { %v4230_v46 = vpack.c.bf16 %v1649_v45, %v1648_v43 }
 0xa33   :  { %v1319_v49 = vmul.f32 1.442695, %v1316_v47 }
 0xa34   :  { %v1408_v50 = vpop.permute.xlu1 %1407 }
 0xa35   :  { %4336 = vpow2.f32 %v1319_v49  ;;  %4033 = vmatpush3.msra.mxu1 %v1408_v50 }
 0xa36   :  { %4227 = vmatprep.subr.bf16.mxu1 %v4226_v42 }
 0xa38   :  { %v1486_v8 = vpop.permute.xlu1 %1485 }
 0xa39   :  { %v1507_v11 = vsel %vm167_vm2, %v4572_v14, %v1486_v8  ;;  %v3749_v14 = vld [vmem:[%s5093_s1 + $0x4] ss:$0 sm:$0xff] }
 0xa3b   :  { %v4335_v39 = vpop.eup %4334 }
 0xa3c   :  { %v1321_v51 = vsel %vm167_vm2, %v4335_v39, 0.0  ;;  %v1488_v9 = vpop.permute.xlu1 %1487 }
 0xa3d   :  { %1322 = vadd.xlane.f32.xlu0 %v1321_v51  ;;  %v1508_v18 = vsel %vm167_vm2, %v4574_v16, %v1488_v9  ;;  %v1757_v9 = vld [vmem:[%s5096_s5 + $0x30] sm:$0xff] }
 0xa3f   :  { %v4337_v52 = vpop.eup %4336 }
 0xa40   :  { %v1324_v53 = vsel %vm167_vm2, %v4337_v52, 0.0  ;;  %v1496_v12 = vpop.permute.xlu1 %1495 }
 0xa41   :  { %1325 = vadd.xlane.f32.xlu0 %v1324_v53  ;;  %v1511_v19 = vsel %vm1509_vm4, %v1508_v18, %v1496_v12  ;;  %v3752_v12 = vld [vmem:[%s5093_s1 + $0x7] ss:$0 sm:$0xff] }
 0xa57   :  { %1331 = vrot.lane.b32.xlu0 %v4508_v41, %s4420_s27  ;;  %v1515_v41 = vld [vmem:[%s5094_s3] sm:$0xff] }
 0xa58   :  { %v4218_v62 = vpack.c.bf16 %v1516_v61, %v1515_v41 }
 0xa5b   :  { %1493 = vrot.lane.b32.xlu0 %v1073_v27, %s4422_s29 }
 0xaca   :  { %v1323_v54 = vpop.xlane.xlu0 %1322 }
 0xacb   :  { %4338 = vrcp.f32 %v1323_v54  ;;  %v3750_v54 = vld [vmem:[%s5093_s1 + $0x2] ss:$0 sm:$0xff] }
 0xace   :  { %v1326_v55 = vpop.xlane.xlu0 %1325 }
 0xacf   :  { %4340 = vrcp.f32 %v1326_v55 }
 0xad2   :  { %v1332_v56 = vpop.permute.xlu0 %1331 }
 0xad3   :  { %4028 = vmatpush3.msra.mxu0 %v1332_v56  ;;  %v3751_v56 = vld [vmem:[%s5093_s1 + $0x3] ss:$0 sm:$0xff] }
 0xad4   :  { %4219 = vmatprep.subr.bf16.mxu0 %v4218_v62 }
 0xad5   :  { %v4339_v57 = vpop.eup %4338 }
 0xad6   :  { %v1329_v58 = vmul.f32 %v4339_v57, %v4335_v39  ;;  %v1494_v10 = vpop.permute.xlu0 %1493 }
 0xad7   :  { %v1510_v13 = vsel %vm1509_vm4, %v1507_v11, %v1494_v10  ;;  %v1758_v10 = vld [vmem:[%s5096_s5 + $0x38] sm:$0xff] }
 0xad8   :  { %4030 = vmatmul.mubr.msk.f32.vlgmr.msra.gmra.mrb[12].mxu0 %vm167_vm2, %v1329_v58  ;;  %v4246_v11 = vpack.c.bf16 %v1758_v10, %v1757_v9  ;;  %v3766_v9 = vld [vmem:[%s5093_s1 + $0xe] ss:$0 sm:$0xff] }
 0xad9   :  { %v4341_v59 = vpop.eup %4340  ;;  %4221 = vmatpush3.bf16.msra.mxu0 %v4218_v62  ;;  %v1751_v62 = vld [vmem:[%s5096_s5] sm:$0xff] }
 0xada   :  { %v1330_v60 = vmul.f32 %v4341_v59, %v4337_v52  ;;  %4223 = vmatprep.subr.bf16.mxu0 %v4222_v3  ;;  %v4234_v2 = vpack.c.bf16 %v1752_v63, %v1751_v62  ;;  %v3760_v62 = vld [vmem:[%s5093_s1 + $0x8] ss:$0 sm:$0xff] }
 0xadc   :  { %4035 = vmatmul.mubr.msk.f32.vlgmr.msra.gmra.mrb[18].mxu1 %vm167_vm2, %v1330_v60 }
 0xadd   :  { %4225 = vmatpush3.bf16.msra.mxu0 %v4222_v3  ;;  %4229 = vmatpush3.bf16.msra.mxu1 %v4226_v42  ;;  %v1753_v3 = vld [vmem:[%s5096_s5 + $0x10] sm:$0xff] }
 0xade   :  { %4231 = vmatprep.subr.bf16.mxu1 %v4230_v46  ;;  %4235 = vmatprep.subr.bf16.mxu0 %v4234_v2 }
 0xae1   :  { %4233 = vmatpush3.bf16.msra.mxu1 %v4230_v46 }
 0xbab   :  { %v1403_v4 = vpop.f32.mrb[12].mxu0 }
 0xbac   :  { %1501 = vrot.lane.b32.xlu0 %v1403_v4, %s4423_s15  ;;  %v4031_v5 = vpop.f32.mrb[13].mxu0  ;;  %v1754_v4 = vld [vmem:[%s5096_s5 + $0x18] sm:$0xff] }
 0xbad   :  { %v4238_v5 = vpack.c.bf16 %v1754_v4, %v1753_v3  ;;  %v3761_v4 = vld [vmem:[%s5093_s1 + $0x9] ss:$0 sm:$0xff] }
 0xbaf   :  { %v1479_v6 = vpop.f32.mrb[18].mxu1 }
 0xbb0   :  { %1503 = vrot.lane.b32.xlu1 %v1479_v6, %s4423_s15  ;;  %v4036_v7 = vpop.f32.mrb[19].mxu1  ;;  %v1755_v6 = vld [vmem:[%s5096_s5 + $0x20] sm:$0xff] }
 0xbb1   :  { %v1756_v7 = vld [vmem:[%s5096_s5 + $0x28] sm:$0xff] }
 0xbb2   :  { %v4242_v8 = vpack.c.bf16 %v1756_v7, %v1755_v6 }
 0xc1e   :  { %v1502_v15 = vpop.permute.xlu0 %1501 }
 0xc1f   :  { %v1513_v17 = vsel %vm1512_vm3, %v1510_v13, %v1502_v15 }
 0xc20   :  { %4045 = vmatprep.mubr.msk.f32.mxu0 %vm35_vm0, %v1513_v17 }
 0xc22   :  { %v1504_v20 = vpop.permute.xlu1 %1503 }
 0xc23   :  { %v1514_v21 = vsel %vm1512_vm3, %v1511_v19, %v1504_v20 }
 0xc24   :  { %4046 = vmatmul.mubr.msk.f32.vlgmr.msra.gmra.mrb[14].mxu0 %vm35_vm0, %v1514_v21 }
 0xc25   :  { %4237 = vmatpush3.bf16.msra.mxu0 %v4234_v2 }
 0xc26   :  { %4239 = vmatprep.subr.bf16.mxu0 %v4238_v5 }
 0xc29   :  { %4241 = vmatpush3.bf16.msra.mxu0 %v4238_v5 }
 0xc2a   :  { %4243 = vmatprep.subr.bf16.mxu0 %v4242_v8 }
 0xc2d   :  { %4245 = vmatpush3.bf16.msra.mxu0 %v4242_v8 }
 0xc2e   :  { %4247 = vmatprep.subr.bf16.mxu0 %v4246_v11 }
 0xc31   :  { %4249 = vmatpush3.bf16.msra.mxu0 %v4246_v11 }
 0xc32   :  { %4099 = vmatprep.subr.mxu0 %v4408_v36 }
 0xcf7   :  { %v4047_v22 = vpop.f32.mrb[14].mxu0 }
 0xcf8   :  { %v1601_v23 = vadd.f32 %v4047_v22, %v4467_v1  ;;  %v1591_v24 = vpop.f32.mrb[15].mxu0 }
 0xcf9   :  { %v1600_v25 = vadd.f32 %v1591_v24, %v4462_v0 }
 0xcfa   :  { %v4699_v26 = vadd.f32 %v3749_v14, %v1601_v23 }
 0xcfb   :  { %v4701_v16 = vadd.f32 %v3749_v14, %v1600_v25 }
 0xcfc   :  { %v1611_v27 = vsel %vm35_vm0, %v4699_v26, 0.0 }
 0xcfd   :  { %1612 = vadd.xlane.f32.xlu1 %v1611_v27  ;;  %v1608_v28 = vsel %vm35_vm0, %v4701_v16, 0.0 }
 0xcfe   :  { %1609 = vadd.xlane.f32.xlu0 %v1608_v28 }
 0xd8a   :  { %v1613_v29 = vpop.xlane.xlu1 %1612 }
 0xd8b   :  { %v1615_v30 = vmul.f32 0.03125, %v1613_v29  ;;  %v1610_v31 = vpop.xlane.xlu0 %1609 }
 0xd8c   :  { %v1614_v32 = vmul.f32 0.03125, %v1610_v31  ;;  %v3759_v31 = vld [vmem:[%s5093_s1 + $0x5] ss:$0 sm:$0xff] }
 0xd8d   :  { %v1617_v1 = vsub.f32 %v4699_v26, %v1615_v30 }
 0xd8e   :  { %v1616_v0 = vsub.f32 %v4701_v16, %v1614_v32 }
 0xd8f   :  { %v1619_v35 = vmul.f32 %v1617_v1, %v1617_v1 }
 0xd90   :  { %v1618_v33 = vmul.f32 %v1616_v0, %v1616_v0 }
 0xd91   :  { %v1623_v37 = vsel %vm35_vm0, %v1619_v35, 0.0 }
 0xd92   :  { %v1620_v34 = vsel %vm35_vm0, %v1618_v33, 0.0 }
 0xd93   :  { %1621 = vadd.xlane.f32.xlu0 %v1620_v34 }
 0xd97   :  { %1624 = vadd.xlane.f32.xlu0 %v1623_v37 }
 0xe20   :  { %v1622_v47 = vpop.xlane.xlu0 %1621 }
 0xe21   :  { %v1626_v49 = vmul.f32 0.03125, %v1622_v47 }
 0xe23   :  { %v1628_v50 = vadd.f32 1e-05, %v1626_v49 }
 0xe24   :  { %v1625_v39 = vpop.xlane.xlu0 %1624 }
 0xe25   :  { %4342 = vrsqrt.f32 %v1628_v50  ;;  %v1627_v51 = vmul.f32 0.03125, %v1625_v39  ;;  %v3762_v39 = vld [vmem:[%s5092_s2 + $0x20] sm:$0xff] }
 0xe27   :  { %v1629_v52 = vadd.f32 1e-05, %v1627_v51  ;;  %v3763_v51 = vld [vmem:[%s5092_s2 + $0x28] sm:$0xff] }
 0xe29   :  { %4344 = vrsqrt.f32 %v1629_v52  ;;  %v4250_v52 = vpack.c.bf16 %v3763_v51, %v3762_v39 }
 0xe2b   :  { %4251 = vmatprep.subr.bf16.mxu1 %v4250_v52 }
 0xe2f   :  { %v4343_v53 = vpop.eup %4342 }
 0xe30   :  { %v1632_v55 = vmul.f32 %v4343_v53, %v1616_v0  ;;  %v3764_v53 = vld [vmem:[%s5092_s2 + $0x30] sm:$0xff] }
 0xe32   :  { %v1638_v57 = vmul.f32 %v3750_v54, %v1632_v55 }
 0xe33   :  { %v4345_v58 = vpop.eup %4344 }
 0xe34   :  { %v1633_v59 = vmul.f32 %v4345_v58, %v1617_v1  ;;  %v1644_v60 = vadd.f32 %v3751_v56, %v1638_v57 }
 0xe36   :  { %v1639_v41 = vmul.f32 %v3750_v54, %v1633_v59  ;;  %4056 = vmatprep.mubr.msk.f32.mxu1 %vm35_vm0, %v1644_v60  ;;  %v3765_v54 = vld [vmem:[%s5092_s2 + $0x38] sm:$0xff] }
 0xe37   :  { %v4254_v55 = vpack.c.bf16 %v3765_v54, %v3764_v53 }
 0xe38   :  { %v1645_v61 = vadd.f32 %v3751_v56, %v1639_v41 }
 0xe3a   :  { %4057 = vmatmul.mubr.msk.f32.vlgmr.msra.gmra.mrb[20].mxu1 %vm35_vm0, %v1645_v61 }
 0xe3b   :  { %4253 = vmatpush3.bf16.msra.mxu1 %v4250_v52  ;;  %v4869_v52 = vld [vmem:[%s5093_s1 + $0x18] sm:$0xff] }
 0xe3c   :  { %4255 = vmatprep.subr.bf16.mxu1 %v4254_v55 }
 0xe3f   :  { %4257 = vmatpush3.bf16.msra.mxu1 %v4254_v55 }
 0xe40   :  { %4089 = vmatprep.subr.mxu1 %v4408_v36 }
 0xf0d   :  { %v4058_v13 = vpop.f32.mrb[20].mxu1 }
 0xf0e   :  { %v1732_v15 = vadd.f32 %v4058_v13, %v3752_v12  ;;  %v1726_v17 = vpop.f32.mrb[21].mxu1 }
 0xf0f   :  { %v1727_v18 = vadd.f32 %v3752_v12, %v1726_v17 }
 0xf10   :  { %v3756_v19 = vmul.f32 -1.702, %v1732_v15 }
 0xf11   :  { %v3755_v20 = vmul.f32 -1.702, %v1727_v18 }
 0xf12   :  { %v1741_v21 = vmul.f32 1.442695, %v3756_v19 }
 0xf13   :  { %v1739_v14 = vmul.f32 1.442695, %v3755_v20 }
 0xf14   :  { %4346 = vpow2.f32 %v1741_v21 }
 0xf15   :  { %4348 = vpow2.f32 %v1739_v14 }
 0xf1e   :  { %v4347_v22 = vpop.eup %4346 }
 0xf1f   :  { %v4349_v23 = vpop.eup %4348  ;;  %v1744_v24 = vadd.f32 1.0, %v4347_v22 }
 0xf20   :  { %v1743_v25 = vadd.f32 1.0, %v4349_v23 }
 0xf21   :  { %4350 = vrcp.f32 %v1744_v24 }
 0xf22   :  { %4352 = vrcp.f32 %v1743_v25 }
 0xf2b   :  { %v4351_v27 = vpop.eup %4350 }
 0xf2c   :  { %v4353_v28 = vpop.eup %4352  ;;  %v1750_v30 = vmul.f32 %v4351_v27, %v1732_v15 }
 0xf2d   :  { %v1749_v29 = vmul.f32 %v4353_v28, %v1727_v18 }
 0xf2f   :  { %4075 = vmatprep.mubr.msk.f32.mxu0 %vm1759_vm5, %v1749_v29 }
 0xf30   :  { %4076 = vmatmul.mubr.msk.f32.vlgmr.msra.gmra.mrb[16].mxu0 %vm1759_vm5, %v1750_v30 }
 0xf31   :  { %4101 = vmatprep.mubr.msk.f32.mxu0 %vm4409_vm1, %v4408_v36 }
0x1003   :  { %v4077_v32 = vpop.f32.mrb[16].mxu0 }
0x1004   :  { %v1842_v1 = vadd.f32 %v4077_v32, %v4699_v26  ;;  %v1832_v0 = vpop.f32.mrb[17].mxu0 }
0x1005   :  { %v1841_v33 = vadd.f32 %v1832_v0, %v4701_v16 }
0x1006   :  { %v4768_v34 = vadd.f32 %v3759_v31, %v1842_v1 }
0x1007   :  { %v4770_v35 = vadd.f32 %v3759_v31, %v1841_v33 }
0x1008   :  { %v1860_v37 = vsel %vm35_vm0, %v4768_v34, 0.0 }
0x1009   :  { %1861 = vadd.xlane.f32.xlu1 %v1860_v37  ;;  %v1857_v38 = vsel %vm35_vm0, %v4770_v35, 0.0 }
0x100a   :  { %1858 = vadd.xlane.f32.xlu0 %v1857_v38 }
0x1096   :  { %v1862_v40 = vpop.xlane.xlu1 %1861 }
0x1097   :  { %v1864_v42 = vmul.f32 0.03125, %v1862_v40  ;;  %v1859_v43 = vpop.xlane.xlu0 %1858 }
0x1098   :  { %v1863_v45 = vmul.f32 0.03125, %v1859_v43 }
0x1099   :  { %v1866_v26 = vsub.f32 %v4768_v34, %v1864_v42 }
0x109a   :  { %v1865_v16 = vsub.f32 %v4770_v35, %v1863_v45 }
0x109b   :  { %v1868_v46 = vmul.f32 %v1866_v26, %v1866_v26 }
0x109c   :  { %v1867_v47 = vmul.f32 %v1865_v16, %v1865_v16 }
0x109d   :  { %v1872_v49 = vsel %vm35_vm0, %v1868_v46, 0.0 }
0x109e   :  { %1873 = vadd.xlane.f32.xlu1 %v1872_v49  ;;  %v1869_v50 = vsel %vm35_vm0, %v1867_v47, 0.0 }
0x109f   :  { %1870 = vadd.xlane.f32.xlu0 %v1869_v50 }
0x112b   :  { %v1874_v56 = vpop.xlane.xlu1 %1873 }
0x112c   :  { %v1876_v57 = vmul.f32 0.03125, %v1874_v56  ;;  %v1871_v58 = vpop.xlane.xlu0 %1870 }
0x112d   :  { %v1875_v59 = vmul.f32 0.03125, %v1871_v58  ;;  %v4876_v58 = vld [vmem:[%s5093_s1 + $0x20] sm:$0xff] }
0x112e   :  { %v1878_v60 = vadd.f32 1e-05, %v1876_v57 }
0x112f   :  { %v1877_v41 = vadd.f32 1e-05, %v1875_v59 }
0x1130   :  { %4354 = vrsqrt.f32 %v1878_v60 }
0x1131   :  { %4356 = vrsqrt.f32 %v1877_v41 }
0x113a   :  { %v4355_v61 = vpop.eup %4354 }
0x113b   :  { %v4357_v63 = vpop.eup %4356  ;;  %v1882_v2 = vmul.f32 %v4355_v61, %v1866_v26 }
0x113c   :  { %v1881_v3 = vmul.f32 %v4357_v63, %v1865_v16 }
0x113d   :  { %v1888_v5 = vmul.f32 %v3760_v62, %v1882_v2 }
0x113e   :  { %v1887_v6 = vmul.f32 %v3760_v62, %v1881_v3 }
0x113f   :  { %v1894_v8 = vadd.f32 %v3761_v4, %v1888_v5 }
0x1140   :  { %v1893_v7 = vadd.f32 %v3761_v4, %v1887_v6 }
0x1142   :  { %4086 = vmatprep.mubr.msk.f32.mxu1 %vm35_vm0, %v1893_v7 }
0x1143   :  { %4087 = vmatmul.mubr.msk.f32.vlgmr.msra.gmra.mrb[22].mxu1 %vm35_vm0, %v1894_v8 }
0x1144   :  { %4091 = vmatprep.mubr.msk.f32.mxu1 %vm4409_vm1, %v4408_v36 }
0x1216   :  { %v4088_v10 = vpop.f32.mrb[22].mxu1 }
0x1217   :  { %v4806_v11 = vadd.f32 %v4088_v10, %v3766_v9  ;;  %v1976_v12 = vpop.f32.mrb[23].mxu1 }
0x1218   :  { %v4808_v13 = vadd.f32 %v3766_v9, %v1976_v12 }
0x1219   :  { %2063 = vrot.lane.b32.xlu1 %v4806_v11, %s4410_s14 }
0x121a   :  { %1986 = vrot.lane.b32.xlu0 %v4808_v13, %s4410_s14 }
0x128b   :  { %v2064_v17 = vpop.permute.xlu1 %2063 }
0x128c   :  { %v1987_v15 = vpop.permute.xlu0 %1986 }
0x128d   :  { %4090 = vmatpush3.xpose.msk.msra.mxu1 %vm167_vm2, %v1987_v15 }
0x128e   :  { %4094 = vmatprep.subr.mxu1 %v4408_v36 }
0x1290   :  { %4092 = vmatmul.mubr.msk.f32.vlgmr.msra.gmra.mrb[24].mxu1 %vm167_vm2, %v4808_v13 }
0x1291   :  { %4095 = vmatpush3.xpose.msk.msra.mxu1 %vm167_vm2, %v2064_v17  ;;  %4096 = vmatprep.mubr.msk.f32.mxu1 %vm4409_vm1, %v4408_v36 }
0x1292   :  { %4104 = vmatprep.subr.mxu1 %v4408_v36 }
0x1294   :  { %4097 = vmatmul.mubr.msk.f32.vlgmr.msra.gmra.mrb[26].mxu1 %vm167_vm2, %v4806_v11 }
0x1295   :  { %4106 = vmatprep.mubr.msk.f32.mxu1 %vm4409_vm1, %v4408_v36 }
0x1363   :  { %v2058_v18 = vpop.f32.mrb[24].mxu1 }
0x1364   :  { %v2059_v19 = vadd.f32 %v2058_v18, %v4529_v44  ;;  %v4093_v20 = vpop.f32.mrb[25].mxu1 }
0x1366   :  { %v2139_v21 = vsel %vm167_vm2, %v2059_v19, -inf }
0x1367   :  { %2140 = vmax.xlane.f32.xlu1 %v2139_v21  ;;  %v2135_v14 = vpop.f32.mrb[26].mxu1 }
0x1368   :  { %v2136_v22 = vadd.f32 %v2135_v14, %v4535_v48  ;;  %v4098_v23 = vpop.f32.mrb[27].mxu1 }
0x136a   :  { %v2142_v24 = vsel %vm167_vm2, %v2136_v22, -inf }
0x136b   :  { %2143 = vmax.xlane.f32.xlu0 %v2142_v24 }
0x1378   :  { %2237 = vrot.lane.b32.xlu1 %v4806_v11, %s4411_s19 }
0x137c   :  { %2315 = vrot.lane.b32.xlu1 %v4808_v13, %s4412_s20 }
0x1380   :  { %2393 = vrot.lane.b32.xlu1 %v4806_v11, %s4412_s20 }
0x1381   :  { %2161 = vrot.lane.b32.xlu0 %v4808_v13, %s4411_s19 }
0x13f4   :  { %v2141_v44 = vpop.xlane.xlu1 %2140 }
0x13f5   :  { %v2145_v25 = vsub.f32 %v2059_v19, %v2141_v44 }
0x13f7   :  { %v2147_v27 = vmul.f32 1.442695, %v2145_v25 }
0x13f8   :  { %v2238_v48 = vpop.permute.xlu1 %2237  ;;  %v2144_v28 = vpop.xlane.xlu0 %2143 }
0x13f9   :  { %4358 = vpow2.f32 %v2147_v27  ;;  %v2146_v29 = vsub.f32 %v2136_v22, %v2144_v28  ;;  %4105 = vmatpush3.msra.mxu1 %v2238_v48 }
0x13fa   :  { %4114 = vmatprep.subr.mxu1 %v4408_v36 }
0x13fb   :  { %v2149_v30 = vmul.f32 1.442695, %v2146_v29 }
0x13fc   :  { %v2162_v31 = vpop.permute.xlu0 %2161  ;;  %v2316_v37 = vpop.permute.xlu1 %2315 }
0x13fd   :  { %4360 = vpow2.f32 %v2149_v30  ;;  %4100 = vmatpush3.msra.mxu0 %v2162_v31 }
0x13fe   :  { %4109 = vmatprep.subr.mxu0 %v4408_v36 }
0x1400   :  { %v2394_v38 = vpop.permute.xlu1 %2393 }
0x1403   :  { %v4359_v32 = vpop.eup %4358 }
0x1404   :  { %v2151_v1 = vsel %vm167_vm2, %v4359_v32, 0.0 }
0x1405   :  { %2152 = vadd.xlane.f32.xlu0 %v2151_v1 }
0x1407   :  { %v4361_v0 = vpop.eup %4360 }
0x1408   :  { %v2154_v33 = vsel %vm167_vm2, %v4361_v0, 0.0 }
0x1409   :  { %2155 = vadd.xlane.f32.xlu1 %v2154_v33 }
0x141a   :  { %2391 = vrot.lane.b32.xlu1 %v4806_v11, %s4413_s21 }
0x141b   :  { %2313 = vrot.lane.b32.xlu0 %v4808_v13, %s4413_s21 }
0x1492   :  { %v2153_v40 = vpop.xlane.xlu0 %2152 }
0x1493   :  { %4362 = vrcp.f32 %v2153_v40 }
0x1496   :  { %v2156_v42 = vpop.xlane.xlu1 %2155  ;;  %v2314_v46 = vpop.permute.xlu0 %2313 }
0x1497   :  { %4364 = vrcp.f32 %v2156_v42 }
0x149a   :  { %v2392_v47 = vpop.permute.xlu1 %2391 }
0x149d   :  { %v4363_v43 = vpop.eup %4362 }
0x149e   :  { %v2159_v45 = vmul.f32 %v4363_v43, %v4359_v32 }
0x14a0   :  { %4102 = vmatmul.mubr.msk.f32.vlgmr.msra.gmra.mrb[18].mxu0 %vm167_vm2, %v2159_v45 }
0x14a1   :  { %v4365_v26 = vpop.eup %4364  ;;  %4110 = vmatpush3.xpose.msk.msra.mxu0 %vm167_vm2, %v2316_v37  ;;  %4111 = vmatprep.mubr.msk.f32.mxu0 %vm4409_vm1, %v4408_v36 }
0x14a2   :  { %v2160_v16 = vmul.f32 %v4365_v26, %v4361_v0  ;;  %4119 = vmatprep.subr.mxu0 %v4408_v36 }
0x14a4   :  { %4107 = vmatmul.mubr.msk.f32.vlgmr.msra.gmra.mrb[28].mxu1 %vm167_vm2, %v2160_v16  ;;  %4112 = vmatmul.mubr.msk.f32.vlgmr.msra.gmra.mrb[20].mxu0 %vm167_vm2, %v2314_v46 }
0x14a5   :  { %4115 = vmatpush3.xpose.msk.msra.mxu1 %vm167_vm2, %v2394_v38  ;;  %4116 = vmatprep.mubr.msk.f32.mxu1 %vm4409_vm1, %v4408_v36 }
0x14a6   :  { %4124 = vmatprep.subr.mxu1 %v4408_v36  ;;  %4121 = vmatprep.mubr.msk.f32.mxu0 %vm4409_vm1, %v4408_v36 }
0x14a8   :  { %4117 = vmatmul.mubr.msk.f32.vlgmr.msra.gmra.mrb[30].mxu1 %vm167_vm2, %v2392_v47 }
0x14a9   :  { %4126 = vmatprep.mubr.msk.f32.mxu1 %vm4409_vm1, %v4408_v36 }
0x1573   :  { %v4862_v49 = vpop.f32.mrb[18].mxu0 }
0x1574   :  { %v4103_v50 = vpop.f32.mrb[19].mxu0 }
0x1577   :  { %v4864_v39 = vpop.f32.mrb[28].mxu1  ;;  %v2387_v51 = vpop.f32.mrb[20].mxu0 }
0x1578   :  { %v2388_v53 = vadd.f32 %v4869_v52, %v2387_v51  ;;  %v4108_v54 = vpop.f32.mrb[29].mxu1  ;;  %v4113_v55 = vpop.f32.mrb[21].mxu0 }
0x157a   :  { %v2469_v56 = vsel %vm167_vm2, %v2388_v53, -inf }
0x157b   :  { %2470 = vmax.xlane.f32.xlu0 %v2469_v56  ;;  %v2465_v57 = vpop.f32.mrb[30].mxu1 }
0x157c   :  { %v2466_v59 = vadd.f32 %v4876_v58, %v2465_v57  ;;  %v4118_v60 = vpop.f32.mrb[31].mxu1 }
0x157e   :  { %v2472_v41 = vsel %vm167_vm2, %v2466_v59, -inf }
0x157f   :  { %2473 = vmax.xlane.f32.xlu1 %v2472_v41 }
0x1590   :  { %2567 = vrot.lane.b32.xlu1 %v4806_v11, %s4414_s22 }
0x1591   :  { %2491 = vrot.lane.b32.xlu0 %v4808_v13, %s4414_s22 }
0x1594   :  { %2645 = vrot.lane.b32.xlu1 %v4808_v13, %s4415_s23 }
0x1598   :  { %2723 = vrot.lane.b32.xlu1 %v4806_v11, %s4415_s23 }
0x159c   :  { %2721 = vrot.lane.b32.xlu1 %v4806_v11, %s4416_s24 }
0x1608   :  { %v2471_v61 = vpop.xlane.xlu0 %2470 }
0x1609   :  { %v2475_v62 = vsub.f32 %v2388_v53, %v2471_v61 }
0x160b   :  { %v2477_v63 = vmul.f32 1.442695, %v2475_v62 }
0x160c   :  { %v2492_v2 = vpop.permute.xlu0 %2491  ;;  %v2474_v3 = vpop.xlane.xlu1 %2473 }
0x160d   :  { %4366 = vpow2.f32 %v2477_v63  ;;  %v2476_v4 = vsub.f32 %v2466_v59, %v2474_v3  ;;  %4120 = vmatpush3.msra.mxu0 %v2492_v2 }
0x160e   :  { %4129 = vmatprep.subr.mxu0 %v4408_v36 }
0x160f   :  { %v2479_v5 = vmul.f32 1.442695, %v2476_v4 }
0x1610   :  { %v2568_v6 = vpop.permute.xlu1 %2567 }
0x1611   :  { %4368 = vpow2.f32 %v2479_v5  ;;  %4125 = vmatpush3.msra.mxu1 %v2568_v6 }
0x1612   :  { %4134 = vmatprep.subr.mxu1 %v4408_v36 }
0x1614   :  { %v2646_v17 = vpop.permute.xlu1 %2645 }
0x1617   :  { %v4367_v7 = vpop.eup %4366 }
0x1618   :  { %v2481_v8 = vsel %vm167_vm2, %v4367_v7, 0.0  ;;  %v2724_v21 = vpop.permute.xlu1 %2723 }
0x1619   :  { %2482 = vadd.xlane.f32.xlu0 %v2481_v8 }
0x161b   :  { %v4369_v9 = vpop.eup %4368 }
0x161c   :  { %v2484_v10 = vsel %vm167_vm2, %v4369_v9, 0.0  ;;  %v2722_v23 = vpop.permute.xlu1 %2721 }
0x161d   :  { %2485 = vadd.xlane.f32.xlu0 %v2484_v10 }
0x1633   :  { %2643 = vrot.lane.b32.xlu0 %v4808_v13, %s4416_s24 }
0x16a6   :  { %v2483_v12 = vpop.xlane.xlu0 %2482 }
0x16a7   :  { %4370 = vrcp.f32 %v2483_v12 }
0x16aa   :  { %v2486_v15 = vpop.xlane.xlu0 %2485 }
0x16ab   :  { %4372 = vrcp.f32 %v2486_v15 }
0x16ae   :  { %v2644_v22 = vpop.permute.xlu0 %2643 }
0x16b1   :  { %v4371_v18 = vpop.eup %4370 }
0x16b2   :  { %v2489_v19 = vmul.f32 %v4371_v18, %v4367_v7 }
0x16b4   :  { %4122 = vmatmul.mubr.msk.f32.vlgmr.msra.gmra.mrb[22].mxu0 %vm167_vm2, %v2489_v19 }
0x16b5   :  { %v4373_v20 = vpop.eup %4372  ;;  %4130 = vmatpush3.xpose.msk.msra.mxu0 %vm167_vm2, %v2646_v17  ;;  %4131 = vmatprep.mubr.msk.f32.mxu0 %vm4409_vm1, %v4408_v36 }
0x16b6   :  { %v2490_v14 = vmul.f32 %v4373_v20, %v4369_v9  ;;  %4139 = vmatprep.subr.mxu0 %v4408_v36 }
0x16b8   :  { %4127 = vmatmul.mubr.msk.f32.vlgmr.msra.gmra.mrb[32].mxu1 %vm167_vm2, %v2490_v14  ;;  %4132 = vmatmul.mubr.msk.f32.vlgmr.msra.gmra.mrb[24].mxu0 %vm167_vm2, %v2644_v22 }
0x16b9   :  { %4135 = vmatpush3.xpose.msk.msra.mxu1 %vm167_vm2, %v2724_v21  ;;  %4136 = vmatprep.mubr.msk.f32.mxu1 %vm4409_vm1, %v4408_v36 }
0x16ba   :  { %4144 = vmatprep.subr.mxu1 %v4408_v36  ;;  %4141 = vmatprep.mubr.msk.f32.mxu0 %vm4409_vm1, %v4408_v36 }
0x16bc   :  { %4137 = vmatmul.mubr.msk.f32.vlgmr.msra.gmra.mrb[34].mxu1 %vm167_vm2, %v2722_v23 }
0x16bd   :  { %4146 = vmatprep.mubr.msk.f32.mxu1 %vm4409_vm1, %v4408_v36 }
0x1787   :  { %v4912_v24 = vpop.f32.mrb[22].mxu0 }
0x1788   :  { %v4123_v44 = vpop.f32.mrb[23].mxu0 }
0x178b   :  { %v4914_v25 = vpop.f32.mrb[32].mxu1  ;;  %v2717_v27 = vpop.f32.mrb[24].mxu0 }
0x178c   :  { %v2718_v48 = vadd.f32 %v4869_v52, %v2717_v27  ;;  %v4128_v28 = vpop.f32.mrb[33].mxu1  ;;  %v4133_v29 = vpop.f32.mrb[25].mxu0 }
0x178d   :  { %v3794_v28 = vld [vmem:[%s5094_s3 + $0x28] sm:$0xff] }
0x178e   :  { %v2799_v30 = vsel %vm167_vm2, %v2718_v48, -inf }
0x178f   :  { %2800 = vmax.xlane.f32.xlu0 %v2799_v30  ;;  %v2795_v31 = vpop.f32.mrb[34].mxu1  ;;  %v3795_v30 = vld [vmem:[%s5094_s3 + $0x30] sm:$0xff] }
0x1790   :  { %v2796_v32 = vadd.f32 %v4876_v58, %v2795_v31  ;;  %v4138_v1 = vpop.f32.mrb[35].mxu1  ;;  %v3796_v31 = vld [vmem:[%s5094_s3 + $0x38] sm:$0xff] }
0x1792   :  { %v2802_v0 = vsel %vm167_vm2, %v2796_v32, -inf }
0x1793   :  { %2803 = vmax.xlane.f32.xlu1 %v2802_v0 }
0x17a4   :  { %2897 = vrot.lane.b32.xlu1 %v4806_v11, %s4417_s0 }
0x17a5   :  { %2821 = vrot.lane.b32.xlu0 %v4808_v13, %s4417_s0 }
0x17a8   :  { %2975 = vrot.lane.b32.xlu1 %v4808_v13, %s4418_s25 }
0x17ac   :  { %3053 = vrot.lane.b32.xlu1 %v4806_v11, %s4418_s25 }
0x17b0   :  { %3051 = vrot.lane.b32.xlu1 %v4806_v11, %s4419_s26 }
0x181c   :  { %v2801_v33 = vpop.xlane.xlu0 %2800 }
0x181d   :  { %v2805_v37 = vsub.f32 %v2718_v48, %v2801_v33 }
0x181f   :  { %v2807_v38 = vmul.f32 1.442695, %v2805_v37 }
0x1820   :  { %v2822_v40 = vpop.permute.xlu0 %2821  ;;  %v2804_v42 = vpop.xlane.xlu1 %2803 }
0x1821   :  { %4374 = vpow2.f32 %v2807_v38  ;;  %v2806_v43 = vsub.f32 %v2796_v32, %v2804_v42  ;;  %4140 = vmatpush3.msra.mxu0 %v2822_v40  ;;  %v4262_v32 = vpack.c.bf16 %v3796_v31, %v3795_v30  ;;  %v3814_v30 = vld [vmem:[%s5096_s5 + $0x58] sm:$0xff] }
0x1822   :  { %4149 = vmatprep.subr.mxu0 %v4408_v36 }
0x1823   :  { %v2809_v45 = vmul.f32 1.442695, %v2806_v43 }
0x1824   :  { %v2898_v26 = vpop.permute.xlu1 %2897 }
0x1825   :  { %4376 = vpow2.f32 %v2809_v45  ;;  %4145 = vmatpush3.msra.mxu1 %v2898_v26 }
0x1826   :  { %4154 = vmatprep.subr.mxu1 %v4408_v36 }
0x1828   :  { %v2976_v54 = vpop.permute.xlu1 %2975 }
0x182b   :  { %v4375_v16 = vpop.eup %4374 }
0x182c   :  { %v2811_v46 = vsel %vm167_vm2, %v4375_v16, 0.0  ;;  %v3054_v59 = vpop.permute.xlu1 %3053 }
0x182d   :  { %2812 = vadd.xlane.f32.xlu0 %v2811_v46 }
0x182f   :  { %v4377_v47 = vpop.eup %4376 }
0x1830   :  { %v2814_v50 = vsel %vm167_vm2, %v4377_v47, 0.0  ;;  %v3052_v61 = vpop.permute.xlu1 %3051 }
0x1831   :  { %2815 = vadd.xlane.f32.xlu0 %v2814_v50 }
0x1847   :  { %2973 = vrot.lane.b32.xlu0 %v4808_v13, %s4419_s26 }
0x18ba   :  { %v2813_v51 = vpop.xlane.xlu0 %2812 }
0x18bb   :  { %4378 = vrcp.f32 %v2813_v51 }
0x18be   :  { %v2816_v53 = vpop.xlane.xlu0 %2815 }
0x18bf   :  { %4380 = vrcp.f32 %v2816_v53 }
0x18c2   :  { %v2974_v41 = vpop.permute.xlu0 %2973 }
0x18c5   :  { %v4379_v55 = vpop.eup %4378 }
0x18c6   :  { %v2819_v56 = vmul.f32 %v4379_v55, %v4375_v16 }
0x18c8   :  { %4142 = vmatmul.mubr.msk.f32.vlgmr.msra.gmra.mrb[26].mxu0 %vm167_vm2, %v2819_v56 }
0x18c9   :  { %v4381_v57 = vpop.eup %4380  ;;  %4150 = vmatpush3.xpose.msk.msra.mxu0 %vm167_vm2, %v2976_v54  ;;  %4151 = vmatprep.mubr.msk.f32.mxu0 %vm4409_vm1, %v4408_v36 }
0x18ca   :  { %v2820_v60 = vmul.f32 %v4381_v57, %v4377_v47  ;;  %4159 = vmatprep.subr.mxu0 %v4408_v36 }
0x18cc   :  { %4147 = vmatmul.mubr.msk.f32.vlgmr.msra.gmra.mrb[36].mxu1 %vm167_vm2, %v2820_v60  ;;  %4152 = vmatmul.mubr.msk.f32.vlgmr.msra.gmra.mrb[28].mxu0 %vm167_vm2, %v2974_v41 }
0x18cd   :  { %4155 = vmatpush3.xpose.msk.msra.mxu1 %vm167_vm2, %v3054_v59  ;;  %4156 = vmatprep.mubr.msk.f32.mxu1 %vm4409_vm1, %v4408_v36 }
0x18ce   :  { %4164 = vmatprep.subr.mxu1 %v4408_v36  ;;  %4161 = vmatprep.mubr.msk.f32.mxu0 %vm4409_vm1, %v4408_v36 }
0x18d0   :  { %4157 = vmatmul.mubr.msk.f32.vlgmr.msra.gmra.mrb[38].mxu1 %vm167_vm2, %v3052_v61 }
0x18d1   :  { %4166 = vmatprep.mubr.msk.f32.mxu1 %vm4409_vm1, %v4408_v36 }
0x199b   :  { %v2893_v62 = vpop.f32.mrb[26].mxu0 }
0x199c   :  { %v4143_v63 = vpop.f32.mrb[27].mxu0 }
0x199f   :  { %v2969_v2 = vpop.f32.mrb[36].mxu1  ;;  %v3047_v3 = vpop.f32.mrb[28].mxu0 }
0x19a0   :  { %v3048_v4 = vadd.f32 %v4869_v52, %v3047_v3  ;;  %v4148_v5 = vpop.f32.mrb[37].mxu1  ;;  %v4153_v6 = vpop.f32.mrb[29].mxu0 }
0x19a2   :  { %v3129_v7 = vsel %vm167_vm2, %v3048_v4, -inf }
0x19a3   :  { %3130 = vmax.xlane.f32.xlu0 %v3129_v7  ;;  %v3125_v8 = vpop.f32.mrb[38].mxu1  ;;  %v3802_v7 = vld [vmem:[%s5095_s4 + $0x20] sm:$0xff] }
0x19a4   :  { %v3126_v9 = vadd.f32 %v4876_v58, %v3125_v8  ;;  %v4158_v10 = vpop.f32.mrb[39].mxu1  ;;  %v3803_v8 = vld [vmem:[%s5095_s4 + $0x28] sm:$0xff] }
0x19a5   :  { %v3804_v10 = vld [vmem:[%s5095_s4 + $0x30] sm:$0xff] }
0x19a6   :  { %v3132_v12 = vsel %vm167_vm2, %v3126_v9, -inf }
0x19a7   :  { %3133 = vmax.xlane.f32.xlu1 %v3132_v12  ;;  %v3805_v12 = vld [vmem:[%s5095_s4 + $0x38] sm:$0xff] }
0x19b8   :  { %3227 = vrot.lane.b32.xlu1 %v4806_v11, %s4420_s27 }
0x19bc   :  { %3305 = vrot.lane.b32.xlu1 %v4912_v24, %s4421_s28 }
0x19c0   :  { %3307 = vrot.lane.b32.xlu1 %v4914_v25, %s4421_s28 }
0x19c4   :  { %3315 = vrot.lane.b32.xlu1 %v2969_v2, %s4422_s29 }
0x1a30   :  { %v3131_v36 = vpop.xlane.xlu0 %3130 }
0x1a31   :  { %v3135_v52 = vsub.f32 %v3048_v4, %v3131_v36  ;;  %v4270_v36 = vpack.c.bf16 %v3805_v12, %v3804_v10 }
0x1a33   :  { %v3137_v15 = vmul.f32 1.442695, %v3135_v52 }
0x1a34   :  { %v3134_v17 = vpop.xlane.xlu1 %3133 }
0x1a35   :  { %4382 = vpow2.f32 %v3137_v15  ;;  %v3136_v58 = vsub.f32 %v3126_v9, %v3134_v17  ;;  %v4266_v9 = vpack.c.bf16 %v3803_v8, %v3802_v7 }
0x1a37   :  { %v3139_v18 = vmul.f32 1.442695, %v3136_v58 }
0x1a38   :  { %v3228_v19 = vpop.permute.xlu1 %3227 }
0x1a39   :  { %4384 = vpow2.f32 %v3139_v18  ;;  %4165 = vmatpush3.msra.mxu1 %v3228_v19 }
0x1a3a   :  { %4267 = vmatprep.subr.bf16.mxu1 %v4266_v9 }
0x1a3c   :  { %v3306_v38 = vpop.permute.xlu1 %3305 }
0x1a3d   :  { %v3327_v43 = vsel %vm167_vm2, %v4862_v49, %v3306_v38  ;;  %v3799_v49 = vld [vmem:[%s5093_s1 + $0xc] ss:$0 sm:$0xff] }
0x1a3f   :  { %v4383_v20 = vpop.eup %4382 }
0x1a40   :  { %v3141_v11 = vsel %vm167_vm2, %v4383_v20, 0.0  ;;  %v3308_v40 = vpop.permute.xlu1 %3307 }
0x1a41   :  { %3142 = vadd.xlane.f32.xlu0 %v3141_v11  ;;  %v3328_v47 = vsel %vm167_vm2, %v4864_v39, %v3308_v40  ;;  %v3800_v11 = vld [vmem:[%s5093_s1 + $0xa] ss:$0 sm:$0xff]  ;;  %v3806_v40 = vld [vmem:[%s5093_s1 + $0xf] ss:$0 sm:$0xff] }
0x1a43   :  { %v4385_v21 = vpop.eup %4384 }
0x1a44   :  { %v3144_v14 = vsel %vm167_vm2, %v4385_v21, 0.0  ;;  %v3316_v45 = vpop.permute.xlu1 %3315 }
0x1a45   :  { %3145 = vadd.xlane.f32.xlu0 %v3144_v14  ;;  %v3330_v50 = vsel %vm1509_vm4, %v3328_v47, %v3316_v45  ;;  %v3801_v14 = vld [vmem:[%s5093_s1 + $0xb] ss:$0 sm:$0xff] }
0x1a5b   :  { %3151 = vrot.lane.b32.xlu0 %v4808_v13, %s4420_s27  ;;  %v3793_v13 = vld [vmem:[%s5094_s3 + $0x20] sm:$0xff] }
0x1a5c   :  { %v4258_v29 = vpack.c.bf16 %v3794_v28, %v3793_v13  ;;  %v3812_v13 = vld [vmem:[%s5096_s5 + $0x48] sm:$0xff] }
0x1a5f   :  { %3313 = vrot.lane.b32.xlu0 %v2893_v62, %s4422_s29 }
0x1ace   :  { %v3143_v22 = vpop.xlane.xlu0 %3142 }
0x1acf   :  { %4386 = vrcp.f32 %v3143_v22 }
0x1ad2   :  { %v3146_v23 = vpop.xlane.xlu0 %3145 }
0x1ad3   :  { %4388 = vrcp.f32 %v3146_v23 }
0x1ad6   :  { %v3152_v24 = vpop.permute.xlu0 %3151 }
0x1ad7   :  { %4160 = vmatpush3.msra.mxu0 %v3152_v24 }
0x1ad8   :  { %4259 = vmatprep.subr.bf16.mxu0 %v4258_v29 }
0x1ad9   :  { %v4387_v44 = vpop.eup %4386 }
0x1ada   :  { %v3149_v25 = vmul.f32 %v4387_v44, %v4383_v20  ;;  %v3314_v42 = vpop.permute.xlu0 %3313 }
0x1adb   :  { %v3329_v26 = vsel %vm1509_vm4, %v3327_v43, %v3314_v42 }
0x1adc   :  { %4162 = vmatmul.mubr.msk.f32.vlgmr.msra.gmra.mrb[30].mxu0 %vm167_vm2, %v3149_v25 }
0x1add   :  { %v4389_v27 = vpop.eup %4388  ;;  %4261 = vmatpush3.bf16.msra.mxu0 %v4258_v29  ;;  %v3813_v29 = vld [vmem:[%s5096_s5 + $0x50] sm:$0xff] }
0x1ade   :  { %v3150_v48 = vmul.f32 %v4389_v27, %v4385_v21  ;;  %4263 = vmatprep.subr.bf16.mxu0 %v4262_v32  ;;  %v4278_v31 = vpack.c.bf16 %v3814_v30, %v3813_v29 }
0x1ae0   :  { %4167 = vmatmul.mubr.msk.f32.vlgmr.msra.gmra.mrb[40].mxu1 %vm167_vm2, %v3150_v48  ;;  %v3811_v48 = vld [vmem:[%s5096_s5 + $0x40] sm:$0xff] }
0x1ae1   :  { %4265 = vmatpush3.bf16.msra.mxu0 %v4262_v32  ;;  %4269 = vmatpush3.bf16.msra.mxu1 %v4266_v9  ;;  %v4274_v28 = vpack.c.bf16 %v3812_v13, %v3811_v48  ;;  %v3815_v32 = vld [vmem:[%s5096_s5 + $0x60] sm:$0xff] }
0x1ae2   :  { %4271 = vmatprep.subr.bf16.mxu1 %v4270_v36 }
0x1ae3   :  { %4275 = vmatprep.subr.bf16.mxu0 %v4274_v28 }
0x1ae5   :  { %4273 = vmatpush3.bf16.msra.mxu1 %v4270_v36 }
0x1baf   :  { %v3223_v1 = vpop.f32.mrb[30].mxu0 }
0x1bb0   :  { %3321 = vrot.lane.b32.xlu0 %v3223_v1, %s4423_s15  ;;  %v4163_v0 = vpop.f32.mrb[31].mxu0  ;;  %v3816_v1 = vld [vmem:[%s5096_s5 + $0x68] sm:$0xff] }
0x1bb1   :  { %v4282_v0 = vpack.c.bf16 %v3816_v1, %v3815_v32 }
0x1bb3   :  { %v3299_v33 = vpop.f32.mrb[40].mxu1 }
0x1bb4   :  { %3323 = vrot.lane.b32.xlu1 %v3299_v33, %s4423_s15  ;;  %v4168_v37 = vpop.f32.mrb[41].mxu1  ;;  %v3817_v33 = vld [vmem:[%s5096_s5 + $0x70] sm:$0xff] }
0x1bb5   :  { %v3818_v37 = vld [vmem:[%s5096_s5 + $0x78] sm:$0xff] }
0x1bb6   :  { %v4286_v38 = vpack.c.bf16 %v3818_v37, %v3817_v33 }
0x1c22   :  { %v3322_v16 = vpop.permute.xlu0 %3321 }
0x1c23   :  { %v3331_v46 = vsel %vm1512_vm3, %v3329_v26, %v3322_v16 }
0x1c24   :  { %4177 = vmatprep.mubr.msk.f32.mxu0 %vm35_vm0, %v3331_v46 }
0x1c26   :  { %v3324_v51 = vpop.permute.xlu1 %3323 }
0x1c27   :  { %v3332_v53 = vsel %vm1512_vm3, %v3330_v50, %v3324_v51 }
0x1c28   :  { %4178 = vmatmul.mubr.msk.f32.vlgmr.msra.gmra.mrb[32].mxu0 %vm35_vm0, %v3332_v53 }
0x1c29   :  { %4277 = vmatpush3.bf16.msra.mxu0 %v4274_v28 }
0x1c2a   :  { %4279 = vmatprep.subr.bf16.mxu0 %v4278_v31 }
0x1c2d   :  { %4281 = vmatpush3.bf16.msra.mxu0 %v4278_v31 }
0x1c2e   :  { %4283 = vmatprep.subr.bf16.mxu0 %v4282_v0 }
0x1c31   :  { %4285 = vmatpush3.bf16.msra.mxu0 %v4282_v0 }
0x1c32   :  { %4287 = vmatprep.subr.bf16.mxu0 %v4286_v38 }
0x1c35   :  { %4289 = vmatpush3.bf16.msra.mxu0 %v4286_v38 }
0x1cfb   :  { %v4179_v54 = vpop.f32.mrb[32].mxu0 }
0x1cfc   :  { %v3420_v55 = vadd.f32 %v4179_v54, %v4768_v34  ;;  %v3410_v56 = vpop.f32.mrb[33].mxu0 }
0x1cfd   :  { %v3419_v57 = vadd.f32 %v3410_v56, %v4770_v35 }
0x1cfe   :  { %v4999_v59 = vadd.f32 %v3799_v49, %v3420_v55 }
0x1cff   :  { %v5001_v39 = vadd.f32 %v3799_v49, %v3419_v57 }
0x1d00   :  { %v3430_v60 = vsel %vm35_vm0, %v4999_v59, 0.0 }
0x1d01   :  { %3431 = vadd.xlane.f32.xlu1 %v3430_v60  ;;  %v3427_v41 = vsel %vm35_vm0, %v5001_v39, 0.0 }
0x1d02   :  { %3428 = vadd.xlane.f32.xlu0 %v3427_v41  ;;  %v3821_v41 = vld [vmem:[%s5093_s1 + $0xd] ss:$0 sm:$0xff] }
0x1d8e   :  { %v3432_v61 = vpop.xlane.xlu1 %3431 }
0x1d8f   :  { %v3434_v62 = vmul.f32 0.03125, %v3432_v61  ;;  %v3429_v63 = vpop.xlane.xlu0 %3428 }
0x1d90   :  { %v3433_v2 = vmul.f32 0.03125, %v3429_v63 }
0x1d91   :  { %v3436_v34 = vsub.f32 %v4999_v59, %v3434_v62 }
0x1d92   :  { %v3435_v35 = vsub.f32 %v5001_v39, %v3433_v2 }
0x1d93   :  { %v3438_v5 = vmul.f32 %v3436_v34, %v3436_v34 }
0x1d94   :  { %v3437_v3 = vmul.f32 %v3435_v35, %v3435_v35 }
0x1d95   :  { %v3442_v6 = vsel %vm35_vm0, %v3438_v5, 0.0 }
0x1d96   :  { %v3439_v4 = vsel %vm35_vm0, %v3437_v3, 0.0 }
0x1d97   :  { %3440 = vadd.xlane.f32.xlu0 %v3439_v4 }
0x1d9b   :  { %3443 = vadd.xlane.f32.xlu0 %v3442_v6 }
0x1e24   :  { %v3441_v52 = vpop.xlane.xlu0 %3440 }
0x1e25   :  { %v3445_v15 = vmul.f32 0.03125, %v3441_v52 }
0x1e27   :  { %v3447_v17 = vadd.f32 1e-05, %v3445_v15 }
0x1e28   :  { %v3444_v58 = vpop.xlane.xlu0 %3443 }
0x1e29   :  { %4390 = vrsqrt.f32 %v3447_v17  ;;  %v3446_v18 = vmul.f32 0.03125, %v3444_v58 }
0x1e2b   :  { %v3448_v19 = vadd.f32 1e-05, %v3446_v18 }
0x1e2d   :  { %4392 = vrsqrt.f32 %v3448_v19 }
0x1e33   :  { %v4391_v20 = vpop.eup %4390 }
0x1e34   :  { %v3451_v21 = vmul.f32 %v4391_v20, %v3435_v35 }
0x1e36   :  { %v3457_v22 = vmul.f32 %v3800_v11, %v3451_v21 }
0x1e37   :  { %v4393_v23 = vpop.eup %4392 }
0x1e38   :  { %v3452_v24 = vmul.f32 %v4393_v23, %v3436_v34  ;;  %v3463_v44 = vadd.f32 %v3801_v14, %v3457_v22  ;;  %v3825_v22 = vld [vmem:[%s5093_s1 + $0x11] ss:$0 sm:$0xff] }
0x1e3a   :  { %v3458_v25 = vmul.f32 %v3800_v11, %v3452_v24  ;;  %4188 = vmatprep.mubr.msk.f32.mxu1 %vm35_vm0, %v3463_v44  ;;  %v3824_v11 = vld [vmem:[%s5093_s1 + $0x10] ss:$0 sm:$0xff] }
0x1e3c   :  { %v3464_v27 = vadd.f32 %v3801_v14, %v3458_v25 }
0x1e3e   :  { %4189 = vmatmul.mubr.msk.f32.vlgmr.msra.gmra.mrb[42].mxu1 %vm35_vm0, %v3464_v27 }
0x1f11   :  { %v4190_v42 = vpop.f32.mrb[42].mxu1 }
0x1f12   :  { %v3552_v43 = vadd.f32 %v4190_v42, %v3806_v40  ;;  %v3546_v45 = vpop.f32.mrb[43].mxu1 }
0x1f13   :  { %v3547_v26 = vadd.f32 %v3806_v40, %v3546_v45 }
0x1f14   :  { %v3810_v16 = vmul.f32 -1.702, %v3552_v43 }
0x1f15   :  { %v3809_v46 = vmul.f32 -1.702, %v3547_v26 }
0x1f16   :  { %v3561_v47 = vmul.f32 1.442695, %v3810_v16 }
0x1f17   :  { %v3559_v50 = vmul.f32 1.442695, %v3809_v46 }
0x1f18   :  { %4394 = vpow2.f32 %v3561_v47 }
0x1f19   :  { %4396 = vpow2.f32 %v3559_v50 }
0x1f22   :  { %v4395_v51 = vpop.eup %4394 }
0x1f23   :  { %v4397_v53 = vpop.eup %4396  ;;  %v3564_v49 = vadd.f32 1.0, %v4395_v51 }
0x1f24   :  { %v3563_v54 = vadd.f32 1.0, %v4397_v53 }
0x1f25   :  { %4398 = vrcp.f32 %v3564_v49 }
0x1f26   :  { %4400 = vrcp.f32 %v3563_v54 }
0x1f2f   :  { %v4399_v55 = vpop.eup %4398 }
0x1f30   :  { %v4401_v56 = vpop.eup %4400  ;;  %v3570_v60 = vmul.f32 %v4399_v55, %v3552_v43 }
0x1f31   :  { %v3569_v57 = vmul.f32 %v4401_v56, %v3547_v26 }
0x1f33   :  { %4207 = vmatprep.mubr.msk.f32.mxu0 %vm1759_vm5, %v3569_v57 }
0x1f34   :  { %4208 = vmatmul.mubr.msk.f32.vlgmr.msra.gmra.mrb[34].mxu0 %vm1759_vm5, %v3570_v60 }
0x2007   :  { %v4209_v61 = vpop.f32.mrb[34].mxu0 }
0x2008   :  { %v3662_v62 = vadd.f32 %v4209_v61, %v4999_v59  ;;  %v3652_v63 = vpop.f32.mrb[35].mxu0 }
0x2009   :  { %v3661_v2 = vadd.f32 %v3652_v63, %v5001_v39 }
0x200a   :  { %v3668_v34 = vadd.f32 %v3821_v41, %v3662_v62 }
0x200b   :  { %v3667_v35 = vadd.f32 %v3821_v41, %v3661_v2 }
0x200c   :  { %3823 = vst.msk [vmem:[%s5097_s6 + $0x18] sm:$0xff] %vm35_vm0, %v3668_v34  ;;  %v3677_v3 = vsel %vm35_vm0, %v3668_v34, 0.0 }
0x200d   :  { %3822 = vst.msk [vmem:[%s5097_s6 + $0x10] sm:$0xff] %vm35_vm0, %v3667_v35  ;;  %3678 = vadd.xlane.f32.xlu1 %v3677_v3  ;;  %v3674_v59 = vsel %vm35_vm0, %v3667_v35, 0.0 }
0x200e   :  { %3675 = vadd.xlane.f32.xlu0 %v3674_v59 }
0x209a   :  { %v3679_v4 = vpop.xlane.xlu1 %3678 }
0x209b   :  { %v3681_v39 = vmul.f32 0.03125, %v3679_v4  ;;  %v3676_v5 = vpop.xlane.xlu0 %3675 }
0x209c   :  { %v3680_v6 = vmul.f32 0.03125, %v3676_v5 }
0x209d   :  { %v3683_v7 = vsub.f32 %v3668_v34, %v3681_v39 }
0x209e   :  { %v3682_v8 = vsub.f32 %v3667_v35, %v3680_v6 }
0x209f   :  { %v3685_v9 = vmul.f32 %v3683_v7, %v3683_v7 }
0x20a0   :  { %v3684_v10 = vmul.f32 %v3682_v8, %v3682_v8 }
0x20a1   :  { %v3689_v12 = vsel %vm35_vm0, %v3685_v9, 0.0 }
0x20a2   :  { %3690 = vadd.xlane.f32.xlu1 %v3689_v12  ;;  %v3686_v36 = vsel %vm35_vm0, %v3684_v10, 0.0 }
0x20a3   :  { %3687 = vadd.xlane.f32.xlu0 %v3686_v36 }
0x212f   :  { %v3691_v52 = vpop.xlane.xlu1 %3690 }
0x2130   :  { %v3693_v15 = vmul.f32 0.03125, %v3691_v52  ;;  %v3688_v17 = vpop.xlane.xlu0 %3687 }
0x2131   :  { %v3692_v58 = vmul.f32 0.03125, %v3688_v17 }
0x2132   :  { %v3695_v18 = vadd.f32 1e-05, %v3693_v15 }
0x2133   :  { %v3694_v19 = vadd.f32 1e-05, %v3692_v58 }
0x2134   :  { %4402 = vrsqrt.f32 %v3695_v18 }
0x2135   :  { %4404 = vrsqrt.f32 %v3694_v19 }
0x213e   :  { %v4403_v20 = vpop.eup %4402 }
0x213f   :  { %v4405_v21 = vpop.eup %4404  ;;  %v3699_v14 = vmul.f32 %v4403_v20, %v3683_v7 }
0x2140   :  { %v3698_v23 = vmul.f32 %v4405_v21, %v3682_v8 }
0x2141   :  { %v3705_v24 = vmul.f32 %v3824_v11, %v3699_v14 }
0x2142   :  { %v3704_v44 = vmul.f32 %v3824_v11, %v3698_v23 }
0x2143   :  { %v3711_v25 = vadd.f32 %v3825_v22, %v3705_v24 }
0x2144   :  { %v3710_v27 = vadd.f32 %v3825_v22, %v3704_v44 }
0x2145   :  { %3713 = vst.msk [vmem:[%s5097_s6 + $0x8] sm:$0xff] %vm35_vm0, %v3711_v25 }
0x2146   :  { %3712 = vst.msk [vmem:[%s5097_s6] sm:$0xff] %vm35_vm0, %v3710_v27 }

</bundles_post_ra>
